<compile_context>
chip_gen: v7x
topology: tpu7x:2x2x1
jax: 0.10.0
libtpu: 0.0.40
codegen_flags: <defaults>
</compile_context>

<pallas_src>
import math
from functools import partial

import numpy as np
import jax
import jax.numpy as jnp
from jax.experimental import pallas as pl
from jax.experimental.pallas import tpu as pltpu

DATA_DIM = 16
HIDDEN = 64
NUM_COUPLING = 6
LEAKY_SLOPE = 0.2          # nn.LeakyReLU(0.2) in the reference module
PACK = 8                   # batch rows packed per lane row (K=128, out width 128)


# ------------------------------ Pallas kernel ------------------------------ #
def _nice_f_kernel(x_ref, w1_ref, b1_ref, w2_ref, b2_ref, z_ref):
    """z = f(x): 6 additive coupling layers.

    Masks are pre-folded into the (block-diagonal, lane-packed) weights, so each
    layer is dot -> bias -> leaky -> dot -> bias -> residual add.
    """
    n_layers = w1_ref.shape[0]
    z = x_ref[...].astype(jnp.float32)                      # (tb, PACK*D) f32 residual
    for i in range(n_layers):                               # small fixed trip count
        # h = (mask*z) @ W1^T + b1   ==   z @ kron(I_P, mask-folded W1^T) + tiled b1
        h = jnp.dot(z.astype(jnp.bfloat16), w1_ref[i],
                    preferred_element_type=jnp.float32) + b1_ref[i]
        h = jnp.maximum(h, LEAKY_SLOPE * h)                 # LeakyReLU(0.2), f32
        # z += (h @ W2^T + b2)*(1-mask) == h @ kron(I_P,(1-mask)-folded W2^T) + tiled b2m
        z = z + (jnp.dot(h.astype(jnp.bfloat16), w2_ref[i],
                         preferred_element_type=jnp.float32) + b2_ref[i])
    z_ref[...] = z


@partial(jax.jit, static_argnames=("block_rows",))
def nice_f(x, w1k, b1p, w2k, b2p, *, block_rows=1024):
    """Apply the 6 coupling layers.  block_rows counts *packed* rows (PACK orig rows each)."""
    N, D = x.shape
    L, KD, KH = w1k.shape                 # KD = PACK*D, KH = PACK*HIDDEN
    P = KD // D

    # Pad only to a multiple of PACK so the lane-packing reshape is a free view
    # (no-op whenever N % PACK == 0, the common case).
    Np = -(-N // P) * P
    xp = x if Np == N else jnp.pad(x, ((0, Np - N), (0, 0)))
    rows = Np // P
    xp = xp.reshape(rows, KD)                              # lane-dense packed view

    # Tile-size selection: biggest that fits, sublane aligned, and (when the batch
    # allows) at least 2 grid steps so both v7x TensorCores get work.
    tb = min(block_rows, rows)
    if rows >= 16:
        half_aligned = max(8, (-(-rows // 2) + 7) // 8 * 8)
        tb = min(tb, half_aligned)
    if tb != rows:
        tb = max(8, (tb // 8) * 8)        # ragged last block handled via pl.cdiv grid

    grid = (pl.cdiv(rows, tb),)

    zp = pl.pallas_call(
        _nice_f_kernel,
        out_shape=jax.ShapeDtypeStruct((rows, KD), jnp.float32),
        grid=grid,
        in_specs=[
            pl.BlockSpec((tb, KD), lambda i: (i, 0)),       # packed x, batch-tiled
            # constant index maps -> weights/biases stay VMEM-resident across steps
            pl.BlockSpec((L, KD, KH), lambda i: (0, 0, 0)),  # kron(I_P, W1m)   bf16
            pl.BlockSpec((L, 1, KH), lambda i: (0, 0, 0)),   # tiled b1          f32
            pl.BlockSpec((L, KH, KD), lambda i: (0, 0, 0)),  # kron(I_P, W2m)   bf16
            pl.BlockSpec((L, 1, KD), lambda i: (0, 0, 0)),   # tiled (1-mask)*b2 f32
        ],
        out_specs=pl.BlockSpec((tb, KD), lambda i: (i, 0)),
        compiler_params=pltpu.CompilerParams(
            dimension_semantics=("parallel",)),
    )(xp, w1k, b1p, w2k, b2p)

    z = zp.reshape(Np, D)
    return z if Np == N else z[:N]


# -------------------------------- parameters -------------------------------- #
def init_params(key):
    # NICE masks: mask[::2] = 1, flipped when the layer index is even.
    masks_np = []
    for i in range(NUM_COUPLING):
        m = np.zeros(DATA_DIM, dtype=np.float32)
        m[::2] = 1.0
        if i % 2 == 0:
            m = 1.0 - m
        masks_np.append(m)
    masks = jnp.asarray(np.stack(masks_np))                       # (L, D)

    keys = jax.random.split(key, NUM_COUPLING * 4)
    w1, b1, w2, b2 = [], [], [], []
    bound1 = 1.0 / math.sqrt(DATA_DIM)     # nn.Linear default init bound (fan_in)
    bound2 = 1.0 / math.sqrt(HIDDEN)
    for i in range(NUM_COUPLING):
        k1, k2, k3, k4 = keys[4 * i:4 * i + 4]
        w1.append(jax.random.uniform(k1, (HIDDEN, DATA_DIM), jnp.float32, -bound1, bound1))
        b1.append(jax.random.uniform(k2, (HIDDEN,), jnp.float32, -bound1, bound1))
        w2.append(jax.random.uniform(k3, (DATA_DIM, HIDDEN), jnp.float32, -bound2, bound2))
        b2.append(jax.random.uniform(k4, (DATA_DIM,), jnp.float32, -bound2, bound2))
    w1 = jnp.stack(w1)             # (L, H, D)
    b1 = jnp.stack(b1)             # (L, H)
    w2 = jnp.stack(w2)             # (L, D, H)
    b2 = jnp.stack(b2)             # (L, D)
    raw = dict(masks=masks, w1=w1, b1=b1, w2=w2, b2=b2)

    # Host-side folding:
    #   mask folded into W1^T rows, (1-mask) folded into W2^T cols and b2,
    #   then PACK rows are packed per lane row via block-diagonal kron(I_P, .).
    P, L = PACK, NUM_COUPLING
    w1t = jnp.transpose(w1, (0, 2, 1))                             # (L, D, H)
    w2t = jnp.transpose(w2, (0, 2, 1))                             # (L, H, D)
    w1m = w1t * masks[:, :, None]                                  # rows scaled by mask
    w2m = w2t * (1.0 - masks)[:, None, :]                          # cols scaled by 1-mask
    eyeP = jnp.eye(P, dtype=jnp.float32)
    w1k = jnp.einsum("pq,ldh->lpdqh", eyeP, w1m).reshape(
        L, P * DATA_DIM, P * HIDDEN).astype(jnp.bfloat16)          # kron(I_P, W1m)
    w2k = jnp.einsum("pq,lhd->lphqd", eyeP, w2m).reshape(
        L, P * HIDDEN, P * DATA_DIM).astype(jnp.bfloat16)          # kron(I_P, W2m)
    b1p = jnp.tile(b1, (1, P)).reshape(L, 1, P * HIDDEN)           # f32
    b2p = jnp.tile(b2 * (1.0 - masks), (1, P)).reshape(L, 1, P * DATA_DIM)  # f32
    folded = (w1k, b1p, w2k, b2p)
    # Note: ScalingLayer.log_scale_vector is never used by NICE.forward/f(),
    # so it is not materialized here.
    return raw, folded


# -------------------------- ClusterDistribution prior ------------------------ #
def cluster_log_prob(z, K, ks, ns, mu_K, lam_K, oodm=20, oodthresh_perc=0.01):
    # TODO(synk): data-dependent boolean indexing / dynamic per-cluster shapes have
    # no clean static-shape Pallas equivalent; kept as host-side glue.  The reference
    # draws a random permutation to build `_llh_neg` but never uses it, so the
    # returned value is deterministic.
    z = np.asarray(z, dtype=np.float64)
    N, D = z.shape
    Klst = list(range(K))
    oodthresh = N * oodthresh_perc
    oodthresh = min(oodthresh, max(np.sum(ks == k) for k in Klst))
    llh = 0.0
    for k in Klst:
        cs = (ks == k)
        _n = int(np.sum(cs))
        if _n < oodthresh:
            continue
        xk = z[cs]
        sigma = 1.0 / np.sqrt(float(lam_K[k]))          # scale_tril = sigma * I
        mu = np.asarray(mu_K[k], dtype=np.float64)
        d2 = np.sum(((xk - mu) / sigma) ** 2, axis=1)
        logp = -0.5 * d2 - D * np.log(sigma) - 0.5 * D * np.log(2.0 * np.pi)
        _llh_pos = logp / (_n * D)
        llh += float(np.sum(_llh_pos)) + math.log(float(ns[k]))
    return llh


# -------------------------------- NICE.forward ------------------------------- #
def nice_forward(x, K, ks, ns, mu_K, lam_K, folded_params, *, block_rows=1024):
    z = nice_f(x, *folded_params, block_rows=block_rows)
    log_det_jacobian = 0.0   # additive coupling layers never modify logdet in f()
    llh = cluster_log_prob(jax.device_get(z), K, ks, ns, mu_K, lam_K)
    return z, jnp.float32(llh + log_det_jacobian)


# ------------------------------- references --------------------------------- #
def nice_f_ref_f32(x, masks, w1, b1, w2, b2):
    """Pure-JAX replica of the PyTorch forward (full f32, unfolded masks)."""
    z = x.astype(jnp.float32)
    for i in range(NUM_COUPLING):
        mask = masks[i]
        x1 = z * mask
        h = x1 @ w1[i].T + b1[i]
        h = jnp.where(h >= 0, h, LEAKY_SLOPE * h)
        m = h @ w2[i].T + b2[i]
        z = z + m * (1.0 - mask)
    return z


def nice_f_ref_packed(x, w1k, b1p, w2k, b2p):
    """Pure-JAX replica of the exact kernel arithmetic (packed bf16 MXU operands)."""
    N, D = x.shape
    P = w1k.shape[1] // D
    Np = -(-N // P) * P
    xp = x if Np == N else jnp.pad(x, ((0, Np - N), (0, 0)))
    z = xp.reshape(Np // P, P * D).astype(jnp.float32)
    for i in range(NUM_COUPLING):
        h = jnp.dot(z.astype(jnp.bfloat16), w1k[i],
                    preferred_element_type=jnp.float32) + b1p[i]
        h = jnp.maximum(h, LEAKY_SLOPE * h)
        z = z + (jnp.dot(h.astype(jnp.bfloat16), w2k[i],
                         preferred_element_type=jnp.float32) + b2p[i])
    return z.reshape(Np, D)[:N]


if __name__ == "__main__":
    key = jax.random.PRNGKey(0)
    kx, kp, kmu, klam = jax.random.split(key, 4)

    BATCH = 200   # 200 rows -> 25 packed rows: multi-step grid + ragged last block
    x = jax.random.normal(kx, (BATCH, DATA_DIM), jnp.float32)
    raw, folded = init_params(kp)

    K = 3
    ks = np.arange(BATCH, dtype=np.int64) % K
    ns = np.bincount(ks, minlength=K)
    mu_K = np.asarray(jax.random.normal(kmu, (K, DATA_DIM), jnp.float32))
    lam_K = np.asarray(jax.random.uniform(klam, (K,), jnp.float32, 0.5, 2.0))

    # Full forward: Pallas f(x) + host-side cluster prior.  block_rows=8 forces a
    # multi-step batch grid (incl. a ragged last block) so the tiled / resident-weight
    # path is exercised; production default is block_rows=1024 packed rows.
    z, log_likelihood = nice_forward(x, K, ks, ns, mu_K, lam_K, folded, block_rows=8)
    z = jax.block_until_ready(z)
    log_likelihood = jax.block_until_ready(log_likelihood)

    # Correctness: exact-arithmetic packed replica (tight) + f32 PyTorch semantics
    # (bf16 MXU operands -> 3e-2 tolerance, documented).
    z_exact = nice_f_ref_packed(x, *folded)
    z_f32 = nice_f_ref_f32(x, raw["masks"], raw["w1"], raw["b1"], raw["w2"], raw["b2"])
    assert z.shape == (BATCH, DATA_DIM)
    assert jnp.allclose(z, z_exact, atol=1e-4, rtol=1e-4), "Pallas f(x) mismatch (exact)"
    assert jnp.allclose(z, z_f32, atol=3e-2, rtol=3e-2), "Pallas f(x) mismatch (f32 ref)"
    assert np.isfinite(float(log_likelihood)), "non-finite log likelihood"

    print("KERNEL_OK")
</pallas_src>

<mosaic_0001>
module attributes {stable_mosaic.version = 11 : i64} {
  func.func @_nice_f_kernel(%arg0: i32, %arg1: memref<8x128xf32, #tpu.memory_space<vmem>>, %arg2: memref<6x128x512xbf16, #tpu.memory_space<vmem>>, %arg3: memref<6x1x512xf32, #tpu.memory_space<vmem>>, %arg4: memref<6x512x128xbf16, #tpu.memory_space<vmem>>, %arg5: memref<6x1x128xf32, #tpu.memory_space<vmem>>, %arg6: memref<8x128xf32, #tpu.memory_space<vmem>>) attributes {dimension_semantics = [#tpu.dimension_semantics<parallel>], iteration_bounds = array<i64: 4>, scalar_prefetch = 0 : i64, scratch_operands = 0 : i64, tpu.core_type = #tpu.core_type<tc>, window_params = [{transform_indices = @transform_0, window_bounds = array<i64: 8, 128>}, {pipeline_mode = #tpu.pipeline_mode<synchronous>, transform_indices = @transform_1, window_bounds = array<i64: 6, 128, 512>}, {pipeline_mode = #tpu.pipeline_mode<synchronous>, transform_indices = @transform_2, window_bounds = array<i64: 6, 1, 512>}, {pipeline_mode = #tpu.pipeline_mode<synchronous>, transform_indices = @transform_3, window_bounds = array<i64: 6, 512, 128>}, {pipeline_mode = #tpu.pipeline_mode<synchronous>, transform_indices = @transform_4, window_bounds = array<i64: 6, 1, 128>}, {transform_indices = @transform_5, window_bounds = array<i64: 8, 128>}]} {
    %c0 = arith.constant 0 : index
    %c0_0 = arith.constant 0 : index
    %0 = vector.load %arg1[%c0, %c0_0] : memref<8x128xf32, #tpu.memory_space<vmem>>, vector<8x128xf32>
    %1 = arith.truncf %0 : vector<8x128xf32> to vector<8x128xbf16>
    %c0_1 = arith.constant 0 : index
    %c0_2 = arith.constant 0 : index
    %c0_3 = arith.constant 0 : index
    %2 = vector.load %arg2[%c0_1, %c0_2, %c0_3] : memref<6x128x512xbf16, #tpu.memory_space<vmem>>, vector<1x128x512xbf16>
    %3 = vector.shape_cast %2 : vector<1x128x512xbf16> to vector<128x512xbf16>
    %cst = arith.constant dense<0.000000e+00> : vector<8x512xf32>
    %4 = tpu.matmul %1, %3, %cst {dimension_numbers = #tpu.dot_dimension_numbers<[1], [0], [0], [1], [0, 0, 1, 1], [], []>} : vector<8x128xbf16>, vector<128x512xbf16>, vector<8x512xf32> -> vector<8x512xf32>
    %c0_4 = arith.constant 0 : index
    %c0_5 = arith.constant 0 : index
    %c0_6 = arith.constant 0 : index
    %5 = vector.load %arg3[%c0_4, %c0_5, %c0_6] : memref<6x1x512xf32, #tpu.memory_space<vmem>>, vector<1x1x512xf32>
    %6 = vector.shape_cast %5 : vector<1x1x512xf32> to vector<1x512xf32>
    %7 = vector.broadcast %6 : vector<1x512xf32> to vector<8x512xf32>
    %8 = arith.addf %4, %7 : vector<8x512xf32>
    %cst_7 = arith.constant 2.000000e-01 : f32
    %9 = vector.broadcast %cst_7 : f32 to vector<8x512xf32>
    %10 = arith.mulf %9, %8 : vector<8x512xf32>
    %11 = arith.maximumf %8, %10 : vector<8x512xf32>
    %12 = arith.truncf %11 : vector<8x512xf32> to vector<8x512xbf16>
    %c0_8 = arith.constant 0 : index
    %c0_9 = arith.constant 0 : index
    %c0_10 = arith.constant 0 : index
    %13 = vector.load %arg4[%c0_8, %c0_9, %c0_10] : memref<6x512x128xbf16, #tpu.memory_space<vmem>>, vector<1x512x128xbf16>
    %14 = vector.shape_cast %13 : vector<1x512x128xbf16> to vector<512x128xbf16>
    %cst_11 = arith.constant dense<0.000000e+00> : vector<8x128xf32>
    %15 = tpu.matmul %12, %14, %cst_11 {dimension_numbers = #tpu.dot_dimension_numbers<[1], [0], [0], [1], [0, 0, 1, 1], [], []>} : vector<8x512xbf16>, vector<512x128xbf16>, vector<8x128xf32> -> vector<8x128xf32>
    %c0_12 = arith.constant 0 : index
    %c0_13 = arith.constant 0 : index
    %c0_14 = arith.constant 0 : index
    %16 = vector.load %arg5[%c0_12, %c0_13, %c0_14] : memref<6x1x128xf32, #tpu.memory_space<vmem>>, vector<1x1x128xf32>
    %17 = vector.shape_cast %16 : vector<1x1x128xf32> to vector<1x128xf32>
    %18 = vector.broadcast %17 : vector<1x128xf32> to vector<8x128xf32>
    %19 = arith.addf %15, %18 : vector<8x128xf32>
    %20 = arith.addf %0, %19 : vector<8x128xf32>
    %21 = arith.truncf %20 : vector<8x128xf32> to vector<8x128xbf16>
    %c1 = arith.constant 1 : index
    %c0_15 = arith.constant 0 : index
    %c0_16 = arith.constant 0 : index
    %22 = vector.load %arg2[%c1, %c0_15, %c0_16] : memref<6x128x512xbf16, #tpu.memory_space<vmem>>, vector<1x128x512xbf16>
    %23 = vector.shape_cast %22 : vector<1x128x512xbf16> to vector<128x512xbf16>
    %cst_17 = arith.constant dense<0.000000e+00> : vector<8x512xf32>
    %24 = tpu.matmul %21, %23, %cst_17 {dimension_numbers = #tpu.dot_dimension_numbers<[1], [0], [0], [1], [0, 0, 1, 1], [], []>} : vector<8x128xbf16>, vector<128x512xbf16>, vector<8x512xf32> -> vector<8x512xf32>
    %c1_18 = arith.constant 1 : index
    %c0_19 = arith.constant 0 : index
    %c0_20 = arith.constant 0 : index
    %25 = vector.load %arg3[%c1_18, %c0_19, %c0_20] : memref<6x1x512xf32, #tpu.memory_space<vmem>>, vector<1x1x512xf32>
    %26 = vector.shape_cast %25 : vector<1x1x512xf32> to vector<1x512xf32>
    %27 = vector.broadcast %26 : vector<1x512xf32> to vector<8x512xf32>
    %28 = arith.addf %24, %27 : vector<8x512xf32>
    %cst_21 = arith.constant 2.000000e-01 : f32
    %29 = vector.broadcast %cst_21 : f32 to vector<8x512xf32>
    %30 = arith.mulf %29, %28 : vector<8x512xf32>
    %31 = arith.maximumf %28, %30 : vector<8x512xf32>
    %32 = arith.truncf %31 : vector<8x512xf32> to vector<8x512xbf16>
    %c1_22 = arith.constant 1 : index
    %c0_23 = arith.constant 0 : index
    %c0_24 = arith.constant 0 : index
    %33 = vector.load %arg4[%c1_22, %c0_23, %c0_24] : memref<6x512x128xbf16, #tpu.memory_space<vmem>>, vector<1x512x128xbf16>
    %34 = vector.shape_cast %33 : vector<1x512x128xbf16> to vector<512x128xbf16>
    %cst_25 = arith.constant dense<0.000000e+00> : vector<8x128xf32>
    %35 = tpu.matmul %32, %34, %cst_25 {dimension_numbers = #tpu.dot_dimension_numbers<[1], [0], [0], [1], [0, 0, 1, 1], [], []>} : vector<8x512xbf16>, vector<512x128xbf16>, vector<8x128xf32> -> vector<8x128xf32>
    %c1_26 = arith.constant 1 : index
    %c0_27 = arith.constant 0 : index
    %c0_28 = arith.constant 0 : index
    %36 = vector.load %arg5[%c1_26, %c0_27, %c0_28] : memref<6x1x128xf32, #tpu.memory_space<vmem>>, vector<1x1x128xf32>
    %37 = vector.shape_cast %36 : vector<1x1x128xf32> to vector<1x128xf32>
    %38 = vector.broadcast %37 : vector<1x128xf32> to vector<8x128xf32>
    %39 = arith.addf %35, %38 : vector<8x128xf32>
    %40 = arith.addf %20, %39 : vector<8x128xf32>
    %41 = arith.truncf %40 : vector<8x128xf32> to vector<8x128xbf16>
    %c2 = arith.constant 2 : index
    %c0_29 = arith.constant 0 : index
    %c0_30 = arith.constant 0 : index
    %42 = vector.load %arg2[%c2, %c0_29, %c0_30] : memref<6x128x512xbf16, #tpu.memory_space<vmem>>, vector<1x128x512xbf16>
    %43 = vector.shape_cast %42 : vector<1x128x512xbf16> to vector<128x512xbf16>
    %cst_31 = arith.constant dense<0.000000e+00> : vector<8x512xf32>
    %44 = tpu.matmul %41, %43, %cst_31 {dimension_numbers = #tpu.dot_dimension_numbers<[1], [0], [0], [1], [0, 0, 1, 1], [], []>} : vector<8x128xbf16>, vector<128x512xbf16>, vector<8x512xf32> -> vector<8x512xf32>
    %c2_32 = arith.constant 2 : index
    %c0_33 = arith.constant 0 : index
    %c0_34 = arith.constant 0 : index
    %45 = vector.load %arg3[%c2_32, %c0_33, %c0_34] : memref<6x1x512xf32, #tpu.memory_space<vmem>>, vector<1x1x512xf32>
    %46 = vector.shape_cast %45 : vector<1x1x512xf32> to vector<1x512xf32>
    %47 = vector.broadcast %46 : vector<1x512xf32> to vector<8x512xf32>
    %48 = arith.addf %44, %47 : vector<8x512xf32>
    %cst_35 = arith.constant 2.000000e-01 : f32
    %49 = vector.broadcast %cst_35 : f32 to vector<8x512xf32>
    %50 = arith.mulf %49, %48 : vector<8x512xf32>
    %51 = arith.maximumf %48, %50 : vector<8x512xf32>
    %52 = arith.truncf %51 : vector<8x512xf32> to vector<8x512xbf16>
    %c2_36 = arith.constant 2 : index
    %c0_37 = arith.constant 0 : index
    %c0_38 = arith.constant 0 : index
    %53 = vector.load %arg4[%c2_36, %c0_37, %c0_38] : memref<6x512x128xbf16, #tpu.memory_space<vmem>>, vector<1x512x128xbf16>
    %54 = vector.shape_cast %53 : vector<1x512x128xbf16> to vector<512x128xbf16>
    %cst_39 = arith.constant dense<0.000000e+00> : vector<8x128xf32>
    %55 = tpu.matmul %52, %54, %cst_39 {dimension_numbers = #tpu.dot_dimension_numbers<[1], [0], [0], [1], [0, 0, 1, 1], [], []>} : vector<8x512xbf16>, vector<512x128xbf16>, vector<8x128xf32> -> vector<8x128xf32>
    %c2_40 = arith.constant 2 : index
    %c0_41 = arith.constant 0 : index
    %c0_42 = arith.constant 0 : index
    %56 = vector.load %arg5[%c2_40, %c0_41, %c0_42] : memref<6x1x128xf32, #tpu.memory_space<vmem>>, vector<1x1x128xf32>
    %57 = vector.shape_cast %56 : vector<1x1x128xf32> to vector<1x128xf32>
    %58 = vector.broadcast %57 : vector<1x128xf32> to vector<8x128xf32>
    %59 = arith.addf %55, %58 : vector<8x128xf32>
    %60 = arith.addf %40, %59 : vector<8x128xf32>
    %61 = arith.truncf %60 : vector<8x128xf32> to vector<8x128xbf16>
    %c3 = arith.constant 3 : index
    %c0_43 = arith.constant 0 : index
    %c0_44 = arith.constant 0 : index
    %62 = vector.load %arg2[%c3, %c0_43, %c0_44] : memref<6x128x512xbf16, #tpu.memory_space<vmem>>, vector<1x128x512xbf16>
    %63 = vector.shape_cast %62 : vector<1x128x512xbf16> to vector<128x512xbf16>
    %cst_45 = arith.constant dense<0.000000e+00> : vector<8x512xf32>
    %64 = tpu.matmul %61, %63, %cst_45 {dimension_numbers = #tpu.dot_dimension_numbers<[1], [0], [0], [1], [0, 0, 1, 1], [], []>} : vector<8x128xbf16>, vector<128x512xbf16>, vector<8x512xf32> -> vector<8x512xf32>
    %c3_46 = arith.constant 3 : index
    %c0_47 = arith.constant 0 : index
    %c0_48 = arith.constant 0 : index
    %65 = vector.load %arg3[%c3_46, %c0_47, %c0_48] : memref<6x1x512xf32, #tpu.memory_space<vmem>>, vector<1x1x512xf32>
    %66 = vector.shape_cast %65 : vector<1x1x512xf32> to vector<1x512xf32>
    %67 = vector.broadcast %66 : vector<1x512xf32> to vector<8x512xf32>
    %68 = arith.addf %64, %67 : vector<8x512xf32>
    %cst_49 = arith.constant 2.000000e-01 : f32
    %69 = vector.broadcast %cst_49 : f32 to vector<8x512xf32>
    %70 = arith.mulf %69, %68 : vector<8x512xf32>
    %71 = arith.maximumf %68, %70 : vector<8x512xf32>
    %72 = arith.truncf %71 : vector<8x512xf32> to vector<8x512xbf16>
    %c3_50 = arith.constant 3 : index
    %c0_51 = arith.constant 0 : index
    %c0_52 = arith.constant 0 : index
    %73 = vector.load %arg4[%c3_50, %c0_51, %c0_52] : memref<6x512x128xbf16, #tpu.memory_space<vmem>>, vector<1x512x128xbf16>
    %74 = vector.shape_cast %73 : vector<1x512x128xbf16> to vector<512x128xbf16>
    %cst_53 = arith.constant dense<0.000000e+00> : vector<8x128xf32>
    %75 = tpu.matmul %72, %74, %cst_53 {dimension_numbers = #tpu.dot_dimension_numbers<[1], [0], [0], [1], [0, 0, 1, 1], [], []>} : vector<8x512xbf16>, vector<512x128xbf16>, vector<8x128xf32> -> vector<8x128xf32>
    %c3_54 = arith.constant 3 : index
    %c0_55 = arith.constant 0 : index
    %c0_56 = arith.constant 0 : index
    %76 = vector.load %arg5[%c3_54, %c0_55, %c0_56] : memref<6x1x128xf32, #tpu.memory_space<vmem>>, vector<1x1x128xf32>
    %77 = vector.shape_cast %76 : vector<1x1x128xf32> to vector<1x128xf32>
    %78 = vector.broadcast %77 : vector<1x128xf32> to vector<8x128xf32>
    %79 = arith.addf %75, %78 : vector<8x128xf32>
    %80 = arith.addf %60, %79 : vector<8x128xf32>
    %81 = arith.truncf %80 : vector<8x128xf32> to vector<8x128xbf16>
    %c4 = arith.constant 4 : index
    %c0_57 = arith.constant 0 : index
    %c0_58 = arith.constant 0 : index
    %82 = vector.load %arg2[%c4, %c0_57, %c0_58] : memref<6x128x512xbf16, #tpu.memory_space<vmem>>, vector<1x128x512xbf16>
    %83 = vector.shape_cast %82 : vector<1x128x512xbf16> to vector<128x512xbf16>
    %cst_59 = arith.constant dense<0.000000e+00> : vector<8x512xf32>
    %84 = tpu.matmul %81, %83, %cst_59 {dimension_numbers = #tpu.dot_dimension_numbers<[1], [0], [0], [1], [0, 0, 1, 1], [], []>} : vector<8x128xbf16>, vector<128x512xbf16>, vector<8x512xf32> -> vector<8x512xf32>
    %c4_60 = arith.constant 4 : index
    %c0_61 = arith.constant 0 : index
    %c0_62 = arith.constant 0 : index
    %85 = vector.load %arg3[%c4_60, %c0_61, %c0_62] : memref<6x1x512xf32, #tpu.memory_space<vmem>>, vector<1x1x512xf32>
    %86 = vector.shape_cast %85 : vector<1x1x512xf32> to vector<1x512xf32>
    %87 = vector.broadcast %86 : vector<1x512xf32> to vector<8x512xf32>
    %88 = arith.addf %84, %87 : vector<8x512xf32>
    %cst_63 = arith.constant 2.000000e-01 : f32
    %89 = vector.broadcast %cst_63 : f32 to vector<8x512xf32>
    %90 = arith.mulf %89, %88 : vector<8x512xf32>
    %91 = arith.maximumf %88, %90 : vector<8x512xf32>
    %92 = arith.truncf %91 : vector<8x512xf32> to vector<8x512xbf16>
    %c4_64 = arith.constant 4 : index
    %c0_65 = arith.constant 0 : index
    %c0_66 = arith.constant 0 : index
    %93 = vector.load %arg4[%c4_64, %c0_65, %c0_66] : memref<6x512x128xbf16, #tpu.memory_space<vmem>>, vector<1x512x128xbf16>
    %94 = vector.shape_cast %93 : vector<1x512x128xbf16> to vector<512x128xbf16>
    %cst_67 = arith.constant dense<0.000000e+00> : vector<8x128xf32>
    %95 = tpu.matmul %92, %94, %cst_67 {dimension_numbers = #tpu.dot_dimension_numbers<[1], [0], [0], [1], [0, 0, 1, 1], [], []>} : vector<8x512xbf16>, vector<512x128xbf16>, vector<8x128xf32> -> vector<8x128xf32>
    %c4_68 = arith.constant 4 : index
    %c0_69 = arith.constant 0 : index
    %c0_70 = arith.constant 0 : index
    %96 = vector.load %arg5[%c4_68, %c0_69, %c0_70] : memref<6x1x128xf32, #tpu.memory_space<vmem>>, vector<1x1x128xf32>
    %97 = vector.shape_cast %96 : vector<1x1x128xf32> to vector<1x128xf32>
    %98 = vector.broadcast %97 : vector<1x128xf32> to vector<8x128xf32>
    %99 = arith.addf %95, %98 : vector<8x128xf32>
    %100 = arith.addf %80, %99 : vector<8x128xf32>
    %101 = arith.truncf %100 : vector<8x128xf32> to vector<8x128xbf16>
    %c5 = arith.constant 5 : index
    %c0_71 = arith.constant 0 : index
    %c0_72 = arith.constant 0 : index
    %102 = vector.load %arg2[%c5, %c0_71, %c0_72] : memref<6x128x512xbf16, #tpu.memory_space<vmem>>, vector<1x128x512xbf16>
    %103 = vector.shape_cast %102 : vector<1x128x512xbf16> to vector<128x512xbf16>
    %cst_73 = arith.constant dense<0.000000e+00> : vector<8x512xf32>
    %104 = tpu.matmul %101, %103, %cst_73 {dimension_numbers = #tpu.dot_dimension_numbers<[1], [0], [0], [1], [0, 0, 1, 1], [], []>} : vector<8x128xbf16>, vector<128x512xbf16>, vector<8x512xf32> -> vector<8x512xf32>
    %c5_74 = arith.constant 5 : index
    %c0_75 = arith.constant 0 : index
    %c0_76 = arith.constant 0 : index
    %105 = vector.load %arg3[%c5_74, %c0_75, %c0_76] : memref<6x1x512xf32, #tpu.memory_space<vmem>>, vector<1x1x512xf32>
    %106 = vector.shape_cast %105 : vector<1x1x512xf32> to vector<1x512xf32>
    %107 = vector.broadcast %106 : vector<1x512xf32> to vector<8x512xf32>
    %108 = arith.addf %104, %107 : vector<8x512xf32>
    %cst_77 = arith.constant 2.000000e-01 : f32
    %109 = vector.broadcast %cst_77 : f32 to vector<8x512xf32>
    %110 = arith.mulf %109, %108 : vector<8x512xf32>
    %111 = arith.maximumf %108, %110 : vector<8x512xf32>
    %112 = arith.truncf %111 : vector<8x512xf32> to vector<8x512xbf16>
    %c5_78 = arith.constant 5 : index
    %c0_79 = arith.constant 0 : index
    %c0_80 = arith.constant 0 : index
    %113 = vector.load %arg4[%c5_78, %c0_79, %c0_80] : memref<6x512x128xbf16, #tpu.memory_space<vmem>>, vector<1x512x128xbf16>
    %114 = vector.shape_cast %113 : vector<1x512x128xbf16> to vector<512x128xbf16>
    %cst_81 = arith.constant dense<0.000000e+00> : vector<8x128xf32>
    %115 = tpu.matmul %112, %114, %cst_81 {dimension_numbers = #tpu.dot_dimension_numbers<[1], [0], [0], [1], [0, 0, 1, 1], [], []>} : vector<8x512xbf16>, vector<512x128xbf16>, vector<8x128xf32> -> vector<8x128xf32>
    %c5_82 = arith.constant 5 : index
    %c0_83 = arith.constant 0 : index
    %c0_84 = arith.constant 0 : index
    %116 = vector.load %arg5[%c5_82, %c0_83, %c0_84] : memref<6x1x128xf32, #tpu.memory_space<vmem>>, vector<1x1x128xf32>
    %117 = vector.shape_cast %116 : vector<1x1x128xf32> to vector<1x128xf32>
    %118 = vector.broadcast %117 : vector<1x128xf32> to vector<8x128xf32>
    %119 = arith.addf %115, %118 : vector<8x128xf32>
    %120 = arith.addf %100, %119 : vector<8x128xf32>
    %c0_85 = arith.constant 0 : index
    %c0_86 = arith.constant 0 : index
    %121 = vector.load %arg6[%c0_85, %c0_86] : memref<8x128xf32, #tpu.memory_space<vmem>>, vector<8x128xf32>
    tpu.vector_store %arg6[%c0_85, %c0_86], %120 {strides = array<i32>} : memref<8x128xf32, #tpu.memory_space<vmem>>, vector<8x128xf32>,
    return
  }
  func.func @transform_0(%arg0: i32) -> (i32, i32) {
    %c0_i32 = arith.constant 0 : i32
    %c0_i32_0 = arith.constant 0 : i32
    return %arg0, %c0_i32 : i32, i32
  }
  func.func @transform_1(%arg0: i32) -> (i32, i32, i32) {
    %c0_i32 = arith.constant 0 : i32
    %c0_i32_0 = arith.constant 0 : i32
    %c0_i32_1 = arith.constant 0 : i32
    %c0_i32_2 = arith.constant 0 : i32
    return %c0_i32, %c0_i32_0, %c0_i32_1 : i32, i32, i32
  }
  func.func @transform_2(%arg0: i32) -> (i32, i32, i32) {
    %c0_i32 = arith.constant 0 : i32
    %c0_i32_0 = arith.constant 0 : i32
    %c0_i32_1 = arith.constant 0 : i32
    %c0_i32_2 = arith.constant 0 : i32
    return %c0_i32, %c0_i32_0, %c0_i32_1 : i32, i32, i32
  }
  func.func @transform_3(%arg0: i32) -> (i32, i32, i32) {
    %c0_i32 = arith.constant 0 : i32
    %c0_i32_0 = arith.constant 0 : i32
    %c0_i32_1 = arith.constant 0 : i32
    %c0_i32_2 = arith.constant 0 : i32
    return %c0_i32, %c0_i32_0, %c0_i32_1 : i32, i32, i32
  }
  func.func @transform_4(%arg0: i32) -> (i32, i32, i32) {
    %c0_i32 = arith.constant 0 : i32
    %c0_i32_0 = arith.constant 0 : i32
    %c0_i32_1 = arith.constant 0 : i32
    %c0_i32_2 = arith.constant 0 : i32
    return %c0_i32, %c0_i32_0, %c0_i32_1 : i32, i32, i32
  }
  func.func @transform_5(%arg0: i32) -> (i32, i32) {
    %c0_i32 = arith.constant 0 : i32
    %c0_i32_0 = arith.constant 0 : i32
    return %arg0, %c0_i32 : i32, i32
  }
}

</mosaic_0001>

<bundles_post_ra>
// kernel: nice_f.1
= control target key start
LH: loop header
LB: loop body
LE: loop exit
PB: predicated region body
PF: predicated region fallthrough
CT: control target
= control target key end

     0   :  { %10 = vsyncpa [#allocation3], 0  ;;  %s5776_s0 = inlined_call_operand.vmem [shape: f32[25,128], index: 0, kind: input, shape index: {}]   ;;  %s5777_s1 = inlined_call_operand.hbm [shape: bf16[6,128,512], index: 1, kind: input, shape index: {}]   ;;  %s5778_s2 = inlined_call_operand.vmem [shape: f32[6,1,512], index: 2, kind: input, shape index: {}]   ;;  %s5779_s3 = inlined_call_operand.hbm [shape: bf16[6,512,128], index: 3, kind: input, shape index: {}]   ;;  %s5780_s4 = inlined_call_operand.vmem [shape: f32[6,1,128], index: 4, kind: input, shape index: {}]   ;;  %s5781_s5 = inlined_call_operand.vmem [shape: f32[25,128], index: 5, kind: output, shape index: {}]  }
   0x1   :  { %11 = vsyncpa [#allocation5], 0  ;;  %s5567_s18 = smov 0  }
   0x2 LB: > { %s5530_s19 = smov [#allocation2]   ;;  %s5573_s21 = sadd.s32 4294967295, %s5528_s18   ;;  %s5528_s18 = sphi %s5567_s18, %s17_s18  }
   0x3   : > { %s170_s20 = sshll.u32 %s5530_s19, 4  ;;  %p4268_p0 = scmp.ge.s32.totalorder %s5528_s18, 1  ;;  %s171_s20 = int_to_ptr.vmem [resolvable:$true] %s170_s20 }
   0x4   : > { %p158_p1 = scmp.lt.s32.totalorder %s5528_s18, 5  ;;  %p5782_p3 = scmp.eq.s32.totalorder %s5573_s21, 0 }
   0x5   : > { %s5531_s23 = smov [#allocation4]   ;;  %s5458_s28 = scalar_lea.hbm %s5777_s1, 24576 }
   0x6   : > { %p5577_p2 = pnand %p4268_p0, %p158_p1  ;;  %s186_s24 = sshll.u32 %s5531_s23, 4  ;;  %s5590_s24 = int_to_ptr.vmem [resolvable:$true] %s186_s24 }
   0x7   : > { %p5459_p6 = scmp.ne.s32.totalorder %s5777_s1, %s5458_s28  ;;  %p5465_p10 = scmp.lt.u32.totalorder %s5458_s28, %s5777_s1 }
   0x8   : > { %s5784_s22 = scalar_select %p5577_p2, 1, 0 }
   0x9   : > { %p4951_p4 = pneg %p5577_p2 }
   0xb   : > { %p5586_p5 = pnand %p5782_p3, %p4951_p4 }
   0xd   : > { %p5460_p7 = pneg %p5586_p5 }
   0xf   : > { %p5461_p8 = pnand %p5460_p7, %p5459_p6 }
  0x11   : > { %p5462_p9 = pneg %p5461_p8 }
  0x13   : > { %p5467_p11 = pnand %p5465_p10, %p5462_p9 }
  0x15   : > { %5470 = shalt.err (!%p5467_p11)
}
  0x16   : > { %s5471_s8 = scalar_lea.vmem %s171_s20, 24576  ;;  %p5479_p1 = scmp.lt.s32.totalorder %s171_s20, %s171_s20 }
  0x17   : > { %p5472_p12 = scmp.ne.s32.totalorder %s171_s20, %s5471_s8  ;;  %p5480_p4 = scmp.lt.s32.totalorder %s5471_s8, %s5471_s8 }
  0x19   : > { %p5474_p13 = pnand %p5472_p12, %p5460_p7  ;;  %p5481_p3 = por %p5480_p4, %p5479_p1 }
  0x1b   : > { %p5475_p0 = pneg %p5474_p13 }
  0x1d   : > { %p5482_p2 = pnand %p5481_p3, %p5475_p0 }
  0x1f   : > { %5485 = shalt.err (!%p5482_p2)
}
  0x20   : > { %s5532_s9 = smov 256   ;;  %s5533_s10 = smov 16  }
  0x21   : > { %4954 = dma.hbm_to_vmem [thread:$0]  (!%p5586_p5), %s5777_s1, 24576, %s171_s20, [#allocation3], %s5532_s9, %s5532_s9, %s5533_s10  }
  0x22   : > { %s5486_s15 = scalar_lea.hbm %s5779_s3, 24576 }
  0x23   : > { %p5487_p6 = scmp.ne.s32.totalorder %s5779_s3, %s5486_s15  ;;  %p5493_p8 = scmp.lt.u32.totalorder %s5486_s15, %s5779_s3 }
  0x25   : > { %p5489_p2 = pnand %p5487_p6, %p5460_p7 }
  0x27   : > { %p5490_p3 = pneg %p5489_p2 }
  0x29   : > { %p5495_p9 = pnand %p5493_p8, %p5490_p3 }
  0x2b   : > { %5498 = shalt.err (!%p5495_p9)
}
  0x2c   : > { %s5499_s20 = scalar_lea.vmem %s5590_s24, 24576  ;;  %p5507_p13 = scmp.lt.s32.totalorder %s5590_s24, %s5590_s24 }
  0x2d   : > { %p5500_p10 = scmp.ne.s32.totalorder %s5590_s24, %s5499_s20  ;;  %p5508_p0 = scmp.lt.s32.totalorder %s5499_s20, %s5499_s20 }
  0x2f   : > { %p5502_p11 = pnand %p5500_p10, %p5460_p7  ;;  %p5509_p1 = por %p5508_p0, %p5507_p13 }
  0x31   : > { %p5503_p12 = pneg %p5502_p11 }
  0x33   : > { %p5510_p4 = pnand %p5509_p1, %p5503_p12 }
  0x35   : > { %5513 = shalt.err (!%p5510_p4)
}
  0x36   : > { %s5534_s26 = smov 64   ;;  %s5535_s27 = smov 4  }
  0x37   : > { %4957 = dma.hbm_to_vmem [thread:$0]  (!%p5586_p5), %s5779_s3, 24576, %s5590_s24, [#allocation5], %s5534_s26, %s5534_s26, %s5535_s27  }
  0x38   : > { %p5786_p6 = scmp.ne.s32.totalorder %s5784_s22, 0 }
  0x39   : > { %p5787_p7 = scmp.eq.s32.totalorder (!%p5786_p6), %s5573_s21, 0 }
  0x3a   : > { %212 = sbr.rel (%p5786_p6) target bundleno = 2773 (0xad5), region = 40 }
  0x41   : > { %5519 = dma.done.wait (%p5787_p7), [#allocation3], 24576   ;;  %p5788_p2 = pmov %p5787_p7 }
  0x43   : > { %5521 = vsyncadd (%p5788_p2), [#allocation3], 4294942720  ;;  %p5789_p3 = pmov %p5788_p2 }
  0x44   : > { %p5790_p8 = pmov %p5788_p2 }
  0x45   : > { %5523 = dma.done.wait (%p5789_p3), [#allocation5], 24576  }
  0x46   : > { %5525 = vsyncadd (%p5790_p8), [#allocation5], 4294942720  ;;  %v5536_v0 = vmov 0   ;;  %v4977_v1 = vld [vmem:[#allocation2 + $0x4] ss:$16 sps:$4 sm:$0xff]   ;;  %p242_p5 = scmp.lt.s32.totalorder %s5573_s21, 3 }
  0x47   : > { %499 = vmatprep.mubr.bf16.mxu0 %v5536_v0  ;;  %540 = vmatprep.mubr.bf16.mxu1 %v5536_v0  ;;  %v4979_v2 = vld [vmem:[#allocation2 + $0xc] ss:$16 sps:$4 sm:$0xff]   ;;  %v4981_v3 = vld [vmem:[#allocation2] ss:$16 sps:$4 sm:$0xff]   ;;  %v4982_v4 = vld [vmem:[#allocation2 + $0x8] ss:$16 sps:$4 sm:$0xff]  }
  0x48   : > { %467 = vmatprep.subr.bf16.mxu0 %v4977_v1  ;;  %508 = vmatprep.subr.bf16.mxu1 %v4979_v2  ;;  %v4983_v5 = vld [vmem:[#allocation2 + $0x24] ss:$16 sps:$4 sm:$0xff]   ;;  %v4985_v6 = vld [vmem:[#allocation2 + $0x2c] ss:$16 sps:$4 sm:$0xff]   ;;  %v4987_v7 = vld [vmem:[#allocation2 + $0x20] ss:$16 sps:$4 sm:$0xff]  }
  0x49   : > { %468 = vmatpush1.bf16.msra.mxu0 %v4981_v3  ;;  %509 = vmatpush1.bf16.msra.mxu1 %v4982_v4  ;;  %v4988_v8 = vld [vmem:[#allocation2 + $0x28] ss:$16 sps:$4 sm:$0xff]   ;;  %v4989_v9 = vld [vmem:[#allocation2 + $0x44] ss:$16 sps:$4 sm:$0xff]   ;;  %v4991_v10 = vld [vmem:[#allocation2 + $0x4c] ss:$16 sps:$4 sm:$0xff]  }
  0x4a   : > { %469 = vmatprep.subr.bf16.mxu0 %v4983_v5  ;;  %510 = vmatprep.subr.bf16.mxu1 %v4985_v6  ;;  %v4993_v11 = vld [vmem:[#allocation2 + $0x40] ss:$16 sps:$4 sm:$0xff]   ;;  %v4994_v12 = vld [vmem:[#allocation2 + $0x48] ss:$16 sps:$4 sm:$0xff]   ;;  %v4995_v13 = vld [vmem:[#allocation2 + $0x64] ss:$16 sps:$4 sm:$0xff]   ;;  %v287_v6 = vlaneseq }
  0x4b   : > { %v4997_v14 = vld [vmem:[#allocation2 + $0x6c] ss:$16 sps:$4 sm:$0xff]   ;;  %v4999_v15 = vld [vmem:[#allocation2 + $0x60] ss:$16 sps:$4 sm:$0xff]   ;;  %v5000_v16 = vld [vmem:[#allocation2 + $0x68] ss:$16 sps:$4 sm:$0xff]  }
  0x4c   : > { %v5001_v17 = vld [vmem:[#allocation2 + $0x84] ss:$16 sps:$4 sm:$0xff]   ;;  %v5003_v18 = vld [vmem:[#allocation2 + $0x8c] ss:$16 sps:$4 sm:$0xff]   ;;  %v5005_v19 = vld [vmem:[#allocation2 + $0x80] ss:$16 sps:$4 sm:$0xff]  }
  0x4d   : > { %470 = vmatpush1.bf16.msra.mxu0 %v4987_v7  ;;  %511 = vmatpush1.bf16.msra.mxu1 %v4988_v8  ;;  %v5006_v20 = vld [vmem:[#allocation2 + $0x88] ss:$16 sps:$4 sm:$0xff]   ;;  %v5007_v21 = vld [vmem:[#allocation2 + $0xa4] ss:$16 sps:$4 sm:$0xff]   ;;  %s5792_s21 = smov (!%p242_p5, %s5573_s21), 3  ;;  %v288_v7 = vshrl.u32 %v287_v6, 7 }
  0x4e   : > { %471 = vmatprep.subr.bf16.mxu0 %v4989_v9  ;;  %512 = vmatprep.subr.bf16.mxu1 %v4991_v10  ;;  %v5009_v22 = vld [vmem:[#allocation2 + $0xac] ss:$16 sps:$4 sm:$0xff]   ;;  %v5011_v23 = vld [vmem:[#allocation2 + $0xa0] ss:$16 sps:$4 sm:$0xff]   ;;  %v5012_v24 = vld [vmem:[#allocation2 + $0xa8] ss:$16 sps:$4 sm:$0xff]  }
  0x4f   : > { %s4275_s22 = sshll.u32 %s5792_s21, 3  ;;  %v5013_v25 = vld [vmem:[#allocation2 + $0xc4] ss:$16 sps:$4 sm:$0xff]   ;;  %v5015_v26 = vld [vmem:[#allocation2 + $0xcc] ss:$16 sps:$4 sm:$0xff]   ;;  %v5664_v8 = vsub.s32 0, %v288_v7 }
  0x50   : > { %v5017_v27 = vld [vmem:[#allocation2 + $0xc0] ss:$16 sps:$4 sm:$0xff]   ;;  %v5018_v28 = vld [vmem:[#allocation2 + $0xc8] ss:$16 sps:$4 sm:$0xff]   ;;  %v5019_v29 = vld [vmem:[#allocation2 + $0xe4] ss:$16 sps:$4 sm:$0xff]   ;;  %s5661_s30 = scalar_lea.vmem %s5776_s0, %s4275_s22  ;;  %s249_s10 = scalar_lea.vmem %s5781_s5, %s4275_s22 }
  0x51   : > { %472 = vmatpush1.bf16.msra.mxu0 %v4993_v11  ;;  %513 = vmatpush1.bf16.msra.mxu1 %v4994_v12  ;;  %v5021_v30 = vld [vmem:[#allocation2 + $0xec] ss:$16 sps:$4 sm:$0xff]   ;;  %v5023_v31 = vld [vmem:[#allocation2 + $0xe0] ss:$16 sps:$4 sm:$0xff]   ;;  %v5024_v32 = vld [vmem:[#allocation2 + $0xe8] ss:$16 sps:$4 sm:$0xff]  }
  0x52   : > { %473 = vmatprep.subr.bf16.mxu0 %v4995_v13  ;;  %514 = vmatprep.subr.bf16.mxu1 %v4997_v14  ;;  %v251_v33 = vld [vmem:[%s5661_s30] sm:$0xff]  ;;  %v5029_v39 = vld [vmem:[#allocation4 + $0x48] sm:$0xff]   ;;  %v5033_v43 = vld [vmem:[#allocation4 + $0x50] sm:$0xff]   ;;  %v5666_v9 = vsub.s32 2, %v288_v7  ;;  %v5671_v11 = vsub.s32 1, %v288_v7  ;;  %v5673_v12 = vsub.s32 3, %v288_v7 }
  0x53   : > { %v5025_v34 = vld [vmem:[#allocation4 + $0x40] sm:$0xff]   ;;  %v252_v37 = vpack.c.bf16 %v251_v33, %v251_v33  ;;  %v5030_v40 = vld [vmem:[#allocation4 + $0xc8] sm:$0xff]   ;;  %v5034_v44 = vld [vmem:[#allocation4 + $0xd0] sm:$0xff]  }
  0x54   : > { %v5026_v35 = vld [vmem:[#allocation4 + $0xc0] sm:$0xff]   ;;  %v5031_v41 = vld [vmem:[#allocation4 + $0x8] sm:$0xff]   ;;  %v5035_v45 = vld [vmem:[#allocation4 + $0x10] sm:$0xff]  }
  0x55   : > { %474 = vmatpush1.bf16.msra.mxu0 %v4999_v15  ;;  %515 = vmatpush1.bf16.msra.mxu1 %v5000_v16  ;;  %v5027_v36 = vld [vmem:[#allocation4] sm:$0xff]   ;;  %v5032_v42 = vld [vmem:[#allocation4 + $0x88] sm:$0xff]   ;;  %v5036_v46 = vld [vmem:[#allocation4 + $0x90] sm:$0xff]  }
  0x56   : > { %475 = vmatprep.subr.bf16.mxu0 %v5001_v17  ;;  %516 = vmatprep.subr.bf16.mxu1 %v5003_v18  ;;  %v5028_v38 = vld [vmem:[#allocation4 + $0x80] sm:$0xff]   ;;  %v5037_v47 = vld [vmem:[#allocation4 + $0x58] sm:$0xff]   ;;  %v5045_v55 = vld [vmem:[#allocation4 + $0x68] sm:$0xff]  }
  0x57   : > { %v5038_v48 = vld [vmem:[#allocation4 + $0xd8] sm:$0xff]   ;;  %v5041_v51 = vld [vmem:[#allocation4 + $0x60] sm:$0xff]   ;;  %v5046_v56 = vld [vmem:[#allocation4 + $0xe8] sm:$0xff]  }
  0x58   : > { %v5039_v49 = vld [vmem:[#allocation4 + $0x18] sm:$0xff]   ;;  %v5042_v52 = vld [vmem:[#allocation4 + $0xe0] sm:$0xff]   ;;  %v5047_v57 = vld [vmem:[#allocation4 + $0x28] sm:$0xff]  }
  0x59   : > { %476 = vmatpush1.bf16.msra.mxu0 %v5005_v19  ;;  %517 = vmatpush1.bf16.msra.mxu1 %v5006_v20  ;;  %v5040_v50 = vld [vmem:[#allocation4 + $0x98] sm:$0xff]   ;;  %v5043_v53 = vld [vmem:[#allocation4 + $0x20] sm:$0xff]   ;;  %v5048_v58 = vld [vmem:[#allocation4 + $0xa8] sm:$0xff]  }
  0x5a   : > { %477 = vmatprep.subr.bf16.mxu0 %v5007_v21  ;;  %518 = vmatprep.subr.bf16.mxu1 %v5009_v22  ;;  %v5044_v54 = vld [vmem:[#allocation4 + $0xa0] sm:$0xff]   ;;  %v5049_v59 = vld [vmem:[#allocation4 + $0x70] sm:$0xff]   ;;  %v5053_v63 = vld [vmem:[#allocation4 + $0x78] sm:$0xff]  }
  0x5b   : > { %v5050_v60 = vld [vmem:[#allocation4 + $0xf0] sm:$0xff]   ;;  %v5054_v1 = vld [vmem:[#allocation4 + $0xf8] sm:$0xff]   ;;  %v285_v10 = vld [vmem:[%s5778_s2] sm:$0xf] }
  0x5c   : > { %v5051_v61 = vld [vmem:[#allocation4 + $0x30] sm:$0xff]   ;;  %v5055_v2 = vld [vmem:[#allocation4 + $0x38] sm:$0xff]   ;;  %v290_v13 = vrot.slane %v285_v10, %v5664_v8  ;;  %v298_v14 = vrot.slane %v285_v10, %v5666_v9  ;;  %v294_v15 = vrot.slane %v285_v10, %v5671_v11  ;;  %v302_v16 = vrot.slane %v285_v10, %v5673_v12  ;;  %v5105_v10 = vld [vmem:[#allocation4 + $0x140] sm:$0xff]  }
  0x5d   : > { %478 = vmatpush1.bf16.msra.mxu0 %v5011_v23  ;;  %519 = vmatpush1.bf16.msra.mxu1 %v5012_v24  ;;  %v5052_v62 = vld [vmem:[#allocation4 + $0xb0] sm:$0xff]   ;;  %v5056_v3 = vld [vmem:[#allocation4 + $0xb8] sm:$0xff]  }
  0x5e   : > { %479 = vmatprep.subr.bf16.mxu0 %v5013_v25  ;;  %520 = vmatprep.subr.bf16.mxu1 %v5015_v26  ;;  %v5059_v4 = vld [vmem:[#allocation2 + $0x104] ss:$16 sps:$4 sm:$0xff]   ;;  %v5062_v5 = vld [vmem:[#allocation2 + $0x10c] ss:$16 sps:$4 sm:$0xff]   ;;  %v5099_v6 = vld [vmem:[#allocation2 + $0x1e0] ss:$16 sps:$4 sm:$0xff]  }
  0x5f   : > { %v5102_v7 = vld [vmem:[#allocation2 + $0x1e8] ss:$16 sps:$4 sm:$0xff]  }
  0x61   : > { %480 = vmatpush1.bf16.msra.mxu0 %v5017_v27  ;;  %521 = vmatpush1.bf16.msra.mxu1 %v5018_v28 }
  0x62   : > { %481 = vmatprep.subr.bf16.mxu0 %v5019_v29  ;;  %522 = vmatprep.subr.bf16.mxu1 %v5021_v30 }
  0x65   : > { %482 = vmatpush1.bf16.msra.mxu0 %v5023_v31  ;;  %523 = vmatpush1.bf16.msra.mxu1 %v5024_v32 }
  0x66   : > { %4679 = vmatprep.subr.bf16.mxu0 %v5025_v34  ;;  %4701 = vmatprep.subr.bf16.mxu1 %v5026_v35 }
  0x68   : > { %500 = vmatmul.mubr.bf16.vlgmr.msra.gmra.mrb[0].mxu0 %v252_v37  ;;  %541 = vmatmul.mubr.bf16.vlgmr.msra.gmra.mrb[0].mxu1 %v252_v37 }
  0x69   : > { %4680 = vmatpush3.bf16.msra.mxu0 %v5027_v36  ;;  %4702 = vmatpush3.bf16.msra.mxu1 %v5028_v38 }
  0x6a   : > { %4681 = vmatprep.subr.bf16.mxu0 %v5029_v39  ;;  %4703 = vmatprep.subr.bf16.mxu1 %v5030_v40  ;;  %v5057_v39 = vld [vmem:[#allocation2 + $0x100] ss:$16 sps:$4 sm:$0xff]   ;;  %v5060_v40 = vld [vmem:[#allocation2 + $0x108] ss:$16 sps:$4 sm:$0xff]  }
  0x6d   : > { %4682 = vmatpush3.bf16.msra.mxu0 %v5031_v41  ;;  %4704 = vmatpush3.bf16.msra.mxu1 %v5032_v42 }
  0x6e   : > { %4683 = vmatprep.subr.bf16.mxu0 %v5033_v43  ;;  %4705 = vmatprep.subr.bf16.mxu1 %v5034_v44  ;;  %v5065_v43 = vld [vmem:[#allocation2 + $0x124] ss:$16 sps:$4 sm:$0xff]   ;;  %v5068_v44 = vld [vmem:[#allocation2 + $0x12c] ss:$16 sps:$4 sm:$0xff]  }
  0x71   : > { %4684 = vmatpush3.bf16.msra.mxu0 %v5035_v45  ;;  %4706 = vmatpush3.bf16.msra.mxu1 %v5036_v46  ;;  %v5063_v45 = vld [vmem:[#allocation2 + $0x120] ss:$16 sps:$4 sm:$0xff]   ;;  %v5066_v46 = vld [vmem:[#allocation2 + $0x128] ss:$16 sps:$4 sm:$0xff]  }
  0x72   : > { %4685 = vmatprep.subr.bf16.mxu0 %v5037_v47  ;;  %4707 = vmatprep.subr.bf16.mxu1 %v5038_v48  ;;  %v5071_v47 = vld [vmem:[#allocation2 + $0x144] ss:$16 sps:$4 sm:$0xff]   ;;  %v5074_v48 = vld [vmem:[#allocation2 + $0x14c] ss:$16 sps:$4 sm:$0xff]  }
  0x75   : > { %4686 = vmatpush3.bf16.msra.mxu0 %v5039_v49  ;;  %4708 = vmatpush3.bf16.msra.mxu1 %v5040_v50  ;;  %v5069_v49 = vld [vmem:[#allocation2 + $0x140] ss:$16 sps:$4 sm:$0xff]   ;;  %v5072_v50 = vld [vmem:[#allocation2 + $0x148] ss:$16 sps:$4 sm:$0xff]  }
  0x76   : > { %4687 = vmatprep.subr.bf16.mxu0 %v5041_v51  ;;  %4709 = vmatprep.subr.bf16.mxu1 %v5042_v52  ;;  %v5077_v51 = vld [vmem:[#allocation2 + $0x164] ss:$16 sps:$4 sm:$0xff]   ;;  %v5080_v52 = vld [vmem:[#allocation2 + $0x16c] ss:$16 sps:$4 sm:$0xff]  }
  0x79   : > { %4688 = vmatpush3.bf16.msra.mxu0 %v5043_v53  ;;  %4710 = vmatpush3.bf16.msra.mxu1 %v5044_v54  ;;  %v5075_v53 = vld [vmem:[#allocation2 + $0x160] ss:$16 sps:$4 sm:$0xff]   ;;  %v5078_v54 = vld [vmem:[#allocation2 + $0x168] ss:$16 sps:$4 sm:$0xff]  }
  0x7a   : > { %4689 = vmatprep.subr.bf16.mxu0 %v5045_v55  ;;  %4711 = vmatprep.subr.bf16.mxu1 %v5046_v56  ;;  %v5083_v55 = vld [vmem:[#allocation2 + $0x184] ss:$16 sps:$4 sm:$0xff]   ;;  %v5086_v56 = vld [vmem:[#allocation2 + $0x18c] ss:$16 sps:$4 sm:$0xff]  }
  0x7d   : > { %4690 = vmatpush3.bf16.msra.mxu0 %v5047_v57  ;;  %4712 = vmatpush3.bf16.msra.mxu1 %v5048_v58  ;;  %v5081_v57 = vld [vmem:[#allocation2 + $0x180] ss:$16 sps:$4 sm:$0xff]   ;;  %v5084_v58 = vld [vmem:[#allocation2 + $0x188] ss:$16 sps:$4 sm:$0xff]  }
  0x7e   : > { %4691 = vmatprep.subr.bf16.mxu0 %v5049_v59  ;;  %4713 = vmatprep.subr.bf16.mxu1 %v5050_v60  ;;  %v5089_v59 = vld [vmem:[#allocation2 + $0x1a4] ss:$16 sps:$4 sm:$0xff]   ;;  %v5092_v60 = vld [vmem:[#allocation2 + $0x1ac] ss:$16 sps:$4 sm:$0xff]  }
  0x81   : > { %4692 = vmatpush3.bf16.msra.mxu0 %v5051_v61  ;;  %4714 = vmatpush3.bf16.msra.mxu1 %v5052_v62  ;;  %v5087_v61 = vld [vmem:[#allocation2 + $0x1a0] ss:$16 sps:$4 sm:$0xff]   ;;  %v5090_v62 = vld [vmem:[#allocation2 + $0x1a8] ss:$16 sps:$4 sm:$0xff]  }
  0x82   : > { %4693 = vmatprep.subr.bf16.mxu0 %v5053_v63  ;;  %4715 = vmatprep.subr.bf16.mxu1 %v5054_v1  ;;  %v5095_v63 = vld [vmem:[#allocation2 + $0x1c4] ss:$16 sps:$4 sm:$0xff]   ;;  %v5098_v1 = vld [vmem:[#allocation2 + $0x1cc] ss:$16 sps:$4 sm:$0xff]  }
  0x85   : > { %4694 = vmatpush3.bf16.msra.mxu0 %v5055_v2  ;;  %4716 = vmatpush3.bf16.msra.mxu1 %v5056_v3  ;;  %v5093_v2 = vld [vmem:[#allocation2 + $0x1c0] ss:$16 sps:$4 sm:$0xff]   ;;  %v5096_v3 = vld [vmem:[#allocation2 + $0x1c8] ss:$16 sps:$4 sm:$0xff]  }
  0x86   : > { %1122 = vmatprep.subr.bf16.mxu0 %v5059_v4  ;;  %1163 = vmatprep.subr.bf16.mxu1 %v5062_v5  ;;  %v5101_v4 = vld [vmem:[#allocation2 + $0x1e4] ss:$16 sps:$4 sm:$0xff]   ;;  %v5104_v5 = vld [vmem:[#allocation2 + $0x1ec] ss:$16 sps:$4 sm:$0xff]  }
 0x13b   : > { %v501_v17 = vpop.f32.mrb[0].mxu0  ;;  %v542_v18 = vpop.f32.mrb[0].mxu1 }
 0x13c   : > { %v502_v19 = vadd.f32 %v501_v17, %v290_v13  ;;  %v543_v20 = vadd.f32 %v542_v18, %v298_v14  ;;  %v503_v21 = vpop.f32.mrb[1].mxu0  ;;  %v544_v22 = vpop.f32.mrb[1].mxu1  ;;  %v5106_v13 = vld [vmem:[#allocation4 + $0x1c0] sm:$0xff]  }
 0x13d   : > { %v504_v23 = vadd.f32 %v503_v21, %v294_v15  ;;  %v545_v24 = vadd.f32 %v544_v22, %v302_v16  ;;  %v505_v25 = vpop.f32.mrb[2].mxu0  ;;  %v546_v26 = vpop.f32.mrb[2].mxu1  ;;  %v4309_v16 = vld [vmem:[%s5780_s4] ss:$0 sm:$0xff] }
 0x13e   : > { %v549_v27 = vmul.f32 0.2, %v502_v19  ;;  %v551_v28 = vmul.f32 0.2, %v543_v20  ;;  %v506_v29 = vpop.f32.mrb[3].mxu0  ;;  %v547_v30 = vpop.f32.mrb[3].mxu1 }
 0x13f   : > { %v550_v31 = vmul.f32 0.2, %v504_v23  ;;  %v552_v32 = vmul.f32 0.2, %v545_v24  ;;  %v5107_v29 = vld [vmem:[#allocation4 + $0x100] sm:$0xff]  }
 0x140   : > { %v553_v33 = vmax.f32 %v502_v19, %v549_v27  ;;  %v555_v34 = vmax.f32 %v543_v20, %v551_v28  ;;  %v5457_v27 = vld [vmem:[%s5661_s30] sm:$0xff] }
 0x141   : > { %v554_v35 = vmax.f32 %v504_v23, %v550_v31  ;;  %v556_v36 = vmax.f32 %v545_v24, %v552_v32  ;;  %v5108_v30 = vld [vmem:[#allocation4 + $0x180] sm:$0xff]   ;;  %v5109_v32 = vld [vmem:[#allocation4 + $0x148] sm:$0xff]  }
 0x142   : > { %v557_v41 = vpack.c.bf16 %v553_v33, %v553_v33  ;;  %v559_v42 = vpack.c.bf16 %v555_v34, %v555_v34  ;;  %v5110_v33 = vld [vmem:[#allocation4 + $0x1c8] sm:$0xff]  }
 0x143   : > { %v558_v37 = vpack.c.bf16 %v554_v35, %v554_v35  ;;  %v560_v38 = vpack.c.bf16 %v556_v36, %v556_v36  ;;  %v5111_v34 = vld [vmem:[#allocation4 + $0x108] sm:$0xff]   ;;  %v5113_v36 = vld [vmem:[#allocation4 + $0x150] sm:$0xff]  }
 0x144   : > { %v5112_v35 = vld [vmem:[#allocation4 + $0x188] sm:$0xff]  }
 0x145   : > { %856 = vmatprep.mubr.bf16.mxu0 %v558_v37  ;;  %896 = vmatprep.mubr.bf16.mxu1 %v560_v38  ;;  %v5114_v37 = vld [vmem:[#allocation4 + $0x1d0] sm:$0xff]  }
 0x146   : > { %857 = vmatmul.mubr.bf16.vlgmr.msra.gmra.mrb[4].mxu0 %v557_v41  ;;  %897 = vmatmul.mubr.bf16.vlgmr.msra.gmra.mrb[4].mxu1 %v559_v42  ;;  %v5115_v38 = vld [vmem:[#allocation4 + $0x110] sm:$0xff]   ;;  %v5118_v41 = vld [vmem:[#allocation4 + $0x1d8] sm:$0xff]  }
 0x147   : > { %1123 = vmatpush1.bf16.msra.mxu0 %v5057_v39  ;;  %1164 = vmatpush1.bf16.msra.mxu1 %v5060_v40  ;;  %v5116_v39 = vld [vmem:[#allocation4 + $0x190] sm:$0xff]   ;;  %v5117_v40 = vld [vmem:[#allocation4 + $0x158] sm:$0xff]  }
 0x148   : > { %1124 = vmatprep.subr.bf16.mxu0 %v5065_v43  ;;  %1165 = vmatprep.subr.bf16.mxu1 %v5068_v44  ;;  %v5119_v42 = vld [vmem:[#allocation4 + $0x118] sm:$0xff]   ;;  %v5121_v44 = vld [vmem:[#allocation4 + $0x160] sm:$0xff]  }
 0x149   : > { %1154 = vmatprep.mubr.bf16.mxu0 %v5536_v0  ;;  %1195 = vmatprep.mubr.bf16.mxu1 %v5536_v0  ;;  %v5120_v43 = vld [vmem:[#allocation4 + $0x198] sm:$0xff]  }
 0x14b   : > { %1125 = vmatpush1.bf16.msra.mxu0 %v5063_v45  ;;  %1166 = vmatpush1.bf16.msra.mxu1 %v5066_v46  ;;  %v5122_v45 = vld [vmem:[#allocation4 + $0x1e0] sm:$0xff]  }
 0x14c   : > { %1126 = vmatprep.subr.bf16.mxu0 %v5071_v47  ;;  %1167 = vmatprep.subr.bf16.mxu1 %v5074_v48  ;;  %v5123_v46 = vld [vmem:[#allocation4 + $0x120] sm:$0xff]   ;;  %v5125_v48 = vld [vmem:[#allocation4 + $0x168] sm:$0xff]  }
 0x14d   : > { %v5124_v47 = vld [vmem:[#allocation4 + $0x1a0] sm:$0xff]  }
 0x14f   : > { %1127 = vmatpush1.bf16.msra.mxu0 %v5069_v49  ;;  %1168 = vmatpush1.bf16.msra.mxu1 %v5072_v50  ;;  %v5126_v49 = vld [vmem:[#allocation4 + $0x1e8] sm:$0xff]  }
 0x150   : > { %1128 = vmatprep.subr.bf16.mxu0 %v5077_v51  ;;  %1169 = vmatprep.subr.bf16.mxu1 %v5080_v52  ;;  %v5127_v50 = vld [vmem:[#allocation4 + $0x128] sm:$0xff]   ;;  %v5129_v52 = vld [vmem:[#allocation4 + $0x170] sm:$0xff]  }
 0x151   : > { %v5128_v51 = vld [vmem:[#allocation4 + $0x1a8] sm:$0xff]  }
 0x153   : > { %1129 = vmatpush1.bf16.msra.mxu0 %v5075_v53  ;;  %1170 = vmatpush1.bf16.msra.mxu1 %v5078_v54  ;;  %v5130_v53 = vld [vmem:[#allocation4 + $0x1f0] sm:$0xff]  }
 0x154   : > { %1130 = vmatprep.subr.bf16.mxu0 %v5083_v55  ;;  %1171 = vmatprep.subr.bf16.mxu1 %v5086_v56  ;;  %v5131_v54 = vld [vmem:[#allocation4 + $0x130] sm:$0xff]   ;;  %v5133_v56 = vld [vmem:[#allocation4 + $0x178] sm:$0xff]  }
 0x155   : > { %v5132_v55 = vld [vmem:[#allocation4 + $0x1b0] sm:$0xff]  }
 0x157   : > { %1131 = vmatpush1.bf16.msra.mxu0 %v5081_v57  ;;  %1172 = vmatpush1.bf16.msra.mxu1 %v5084_v58  ;;  %v5134_v57 = vld [vmem:[#allocation4 + $0x1f8] sm:$0xff]  }
 0x158   : > { %1132 = vmatprep.subr.bf16.mxu0 %v5089_v59  ;;  %1173 = vmatprep.subr.bf16.mxu1 %v5092_v60  ;;  %v5135_v58 = vld [vmem:[#allocation4 + $0x138] sm:$0xff]   ;;  %v5139_v60 = vld [vmem:[#allocation2 + $0x204] ss:$16 sps:$4 sm:$0xff]  }
 0x159   : > { %v5136_v59 = vld [vmem:[#allocation4 + $0x1b8] sm:$0xff]  }
 0x15b   : > { %1133 = vmatpush1.bf16.msra.mxu0 %v5087_v61  ;;  %1174 = vmatpush1.bf16.msra.mxu1 %v5090_v62  ;;  %v5142_v61 = vld [vmem:[#allocation2 + $0x20c] ss:$16 sps:$4 sm:$0xff]   ;;  %v4342_v62 = vld [vmem:[%s5778_s2 + $0x4] sm:$0xf] }
 0x15c   : > { %1134 = vmatprep.subr.bf16.mxu0 %v5095_v63  ;;  %1175 = vmatprep.subr.bf16.mxu1 %v5098_v1  ;;  %v945_v63 = vrot.slane %v4342_v62, %v5664_v8  ;;  %v953_v1 = vrot.slane %v4342_v62, %v5666_v9 }
 0x15f   : > { %1135 = vmatpush1.bf16.msra.mxu0 %v5093_v2  ;;  %1176 = vmatpush1.bf16.msra.mxu1 %v5096_v3  ;;  %v949_v2 = vrot.slane %v4342_v62, %v5671_v11  ;;  %v957_v3 = vrot.slane %v4342_v62, %v5673_v12  ;;  %v5182_v62 = vld [vmem:[#allocation2 + $0x2e8] ss:$16 sps:$4 sm:$0xff]  }
 0x160   : > { %1136 = vmatprep.subr.bf16.mxu0 %v5101_v4  ;;  %1177 = vmatprep.subr.bf16.mxu1 %v5104_v5 }
 0x163   : > { %1137 = vmatpush1.bf16.msra.mxu0 %v5099_v6  ;;  %1178 = vmatpush1.bf16.msra.mxu1 %v5102_v7 }
 0x164   : > { %4723 = vmatprep.subr.bf16.mxu0 %v5105_v10  ;;  %4745 = vmatprep.subr.bf16.mxu1 %v5106_v13 }
 0x219   : > { %v4695_v14 = vpop.f32.mrb[4].mxu0  ;;  %v4717_v15 = vpop.f32.mrb[4].mxu1 }
 0x21a   : > { %v4696_v17 = vpop.f32.mrb[5].mxu0  ;;  %v4718_v18 = vpop.f32.mrb[5].mxu1 }
 0x21b   : > { %v4697_v19 = vadd.f32 %v4696_v17, %v4695_v14  ;;  %v4719_v20 = vadd.f32 %v4718_v18, %v4717_v15  ;;  %v4698_v21 = vpop.f32.mrb[6].mxu0  ;;  %v4720_v22 = vpop.f32.mrb[6].mxu1 }
 0x21c   : > { %v4699_v23 = vpop.f32.mrb[7].mxu0  ;;  %v4721_v24 = vpop.f32.mrb[7].mxu1 }
 0x21d   : > { %v859_v25 = vadd.f32 %v4697_v19, %v4309_v16 }
 0x21f   : > { %v899_v26 = vadd.f32 %v4719_v20, %v859_v25 }
 0x221   : > { %v5685_v28 = vadd.f32 %v5457_v27, %v899_v26 }
 0x223   : > { %v905_v31 = vpack.c.bf16 %v5685_v28, %v5685_v28 }
 0x225   : > { %1155 = vmatmul.mubr.bf16.vlgmr.msra.gmra.mrb[8].mxu0 %v905_v31  ;;  %1196 = vmatmul.mubr.bf16.vlgmr.msra.gmra.mrb[8].mxu1 %v905_v31  ;;  %v5137_v31 = vld [vmem:[#allocation2 + $0x200] ss:$16 sps:$4 sm:$0xff]  }
 0x226   : > { %4724 = vmatpush3.bf16.msra.mxu0 %v5107_v29  ;;  %4746 = vmatpush3.bf16.msra.mxu1 %v5108_v30 }
 0x227   : > { %4725 = vmatprep.subr.bf16.mxu0 %v5109_v32  ;;  %4747 = vmatprep.subr.bf16.mxu1 %v5110_v33  ;;  %v5140_v32 = vld [vmem:[#allocation2 + $0x208] ss:$16 sps:$4 sm:$0xff]  }
 0x22a   : > { %4726 = vmatpush3.bf16.msra.mxu0 %v5111_v34  ;;  %4748 = vmatpush3.bf16.msra.mxu1 %v5112_v35  ;;  %v5145_v35 = vld [vmem:[#allocation2 + $0x224] ss:$16 sps:$4 sm:$0xff]  }
 0x22b   : > { %4727 = vmatprep.subr.bf16.mxu0 %v5113_v36  ;;  %4749 = vmatprep.subr.bf16.mxu1 %v5114_v37  ;;  %v5148_v36 = vld [vmem:[#allocation2 + $0x22c] ss:$16 sps:$4 sm:$0xff]   ;;  %v5143_v37 = vld [vmem:[#allocation2 + $0x220] ss:$16 sps:$4 sm:$0xff]  }
 0x22e   : > { %4728 = vmatpush3.bf16.msra.mxu0 %v5115_v38  ;;  %4750 = vmatpush3.bf16.msra.mxu1 %v5116_v39  ;;  %v5146_v38 = vld [vmem:[#allocation2 + $0x228] ss:$16 sps:$4 sm:$0xff]   ;;  %v5151_v39 = vld [vmem:[#allocation2 + $0x244] ss:$16 sps:$4 sm:$0xff]  }
 0x22f   : > { %4729 = vmatprep.subr.bf16.mxu0 %v5117_v40  ;;  %4751 = vmatprep.subr.bf16.mxu1 %v5118_v41  ;;  %v5154_v40 = vld [vmem:[#allocation2 + $0x24c] ss:$16 sps:$4 sm:$0xff]   ;;  %v5149_v41 = vld [vmem:[#allocation2 + $0x240] ss:$16 sps:$4 sm:$0xff]  }
 0x232   : > { %4730 = vmatpush3.bf16.msra.mxu0 %v5119_v42  ;;  %4752 = vmatpush3.bf16.msra.mxu1 %v5120_v43  ;;  %v5152_v42 = vld [vmem:[#allocation2 + $0x248] ss:$16 sps:$4 sm:$0xff]   ;;  %v5157_v43 = vld [vmem:[#allocation2 + $0x264] ss:$16 sps:$4 sm:$0xff]  }
 0x233   : > { %4731 = vmatprep.subr.bf16.mxu0 %v5121_v44  ;;  %4753 = vmatprep.subr.bf16.mxu1 %v5122_v45  ;;  %v5160_v44 = vld [vmem:[#allocation2 + $0x26c] ss:$16 sps:$4 sm:$0xff]   ;;  %v5155_v45 = vld [vmem:[#allocation2 + $0x260] ss:$16 sps:$4 sm:$0xff]  }
 0x236   : > { %4732 = vmatpush3.bf16.msra.mxu0 %v5123_v46  ;;  %4754 = vmatpush3.bf16.msra.mxu1 %v5124_v47  ;;  %v5158_v46 = vld [vmem:[#allocation2 + $0x268] ss:$16 sps:$4 sm:$0xff]   ;;  %v5163_v47 = vld [vmem:[#allocation2 + $0x284] ss:$16 sps:$4 sm:$0xff]  }
 0x237   : > { %4733 = vmatprep.subr.bf16.mxu0 %v5125_v48  ;;  %4755 = vmatprep.subr.bf16.mxu1 %v5126_v49  ;;  %v5166_v48 = vld [vmem:[#allocation2 + $0x28c] ss:$16 sps:$4 sm:$0xff]   ;;  %v5161_v49 = vld [vmem:[#allocation2 + $0x280] ss:$16 sps:$4 sm:$0xff]  }
 0x23a   : > { %4734 = vmatpush3.bf16.msra.mxu0 %v5127_v50  ;;  %4756 = vmatpush3.bf16.msra.mxu1 %v5128_v51  ;;  %v5164_v50 = vld [vmem:[#allocation2 + $0x288] ss:$16 sps:$4 sm:$0xff]   ;;  %v5169_v51 = vld [vmem:[#allocation2 + $0x2a4] ss:$16 sps:$4 sm:$0xff]  }
 0x23b   : > { %4735 = vmatprep.subr.bf16.mxu0 %v5129_v52  ;;  %4757 = vmatprep.subr.bf16.mxu1 %v5130_v53  ;;  %v5172_v52 = vld [vmem:[#allocation2 + $0x2ac] ss:$16 sps:$4 sm:$0xff]   ;;  %v5167_v53 = vld [vmem:[#allocation2 + $0x2a0] ss:$16 sps:$4 sm:$0xff]  }
 0x23e   : > { %4736 = vmatpush3.bf16.msra.mxu0 %v5131_v54  ;;  %4758 = vmatpush3.bf16.msra.mxu1 %v5132_v55  ;;  %v5170_v54 = vld [vmem:[#allocation2 + $0x2a8] ss:$16 sps:$4 sm:$0xff]   ;;  %v5175_v55 = vld [vmem:[#allocation2 + $0x2c4] ss:$16 sps:$4 sm:$0xff]  }
 0x23f   : > { %4737 = vmatprep.subr.bf16.mxu0 %v5133_v56  ;;  %4759 = vmatprep.subr.bf16.mxu1 %v5134_v57  ;;  %v5178_v56 = vld [vmem:[#allocation2 + $0x2cc] ss:$16 sps:$4 sm:$0xff]   ;;  %v5173_v57 = vld [vmem:[#allocation2 + $0x2c0] ss:$16 sps:$4 sm:$0xff]  }
 0x242   : > { %4738 = vmatpush3.bf16.msra.mxu0 %v5135_v58  ;;  %4760 = vmatpush3.bf16.msra.mxu1 %v5136_v59  ;;  %v5176_v58 = vld [vmem:[#allocation2 + $0x2c8] ss:$16 sps:$4 sm:$0xff]   ;;  %v5181_v59 = vld [vmem:[#allocation2 + $0x2e4] ss:$16 sps:$4 sm:$0xff]  }
 0x243   : > { %1779 = vmatprep.subr.bf16.mxu0 %v5139_v60  ;;  %1820 = vmatprep.subr.bf16.mxu1 %v5142_v61  ;;  %v5184_v60 = vld [vmem:[#allocation2 + $0x2ec] ss:$16 sps:$4 sm:$0xff]   ;;  %v5179_v61 = vld [vmem:[#allocation2 + $0x2e0] ss:$16 sps:$4 sm:$0xff]  }
 0x2f8   : > { %v1156_v4 = vpop.f32.mrb[8].mxu0  ;;  %v1197_v5 = vpop.f32.mrb[8].mxu1 }
 0x2f9   : > { %v1157_v6 = vadd.f32 %v1156_v4, %v945_v63  ;;  %v1198_v7 = vadd.f32 %v1197_v5, %v953_v1  ;;  %v1158_v10 = vpop.f32.mrb[9].mxu0  ;;  %v1199_v13 = vpop.f32.mrb[9].mxu1  ;;  %v5185_v63 = vld [vmem:[#allocation4 + $0x240] sm:$0xff]  }
 0x2fa   : > { %v1159_v14 = vadd.f32 %v1158_v10, %v949_v2  ;;  %v1200_v15 = vadd.f32 %v1199_v13, %v957_v3  ;;  %v1160_v16 = vpop.f32.mrb[10].mxu0  ;;  %v1201_v17 = vpop.f32.mrb[10].mxu1  ;;  %v5186_v1 = vld [vmem:[#allocation4 + $0x2c0] sm:$0xff]  }
 0x2fb   : > { %v1204_v18 = vmul.f32 0.2, %v1157_v6  ;;  %v1206_v19 = vmul.f32 0.2, %v1198_v7  ;;  %v1161_v20 = vpop.f32.mrb[11].mxu0  ;;  %v1202_v21 = vpop.f32.mrb[11].mxu1 }
 0x2fc   : > { %v1205_v22 = vmul.f32 0.2, %v1159_v14  ;;  %v1207_v23 = vmul.f32 0.2, %v1200_v15  ;;  %v4376_v4 = vld [vmem:[%s5780_s4 + $0x1] ss:$0 sm:$0xff] }
 0x2fd   : > { %v1208_v24 = vmax.f32 %v1157_v6, %v1204_v18  ;;  %v1210_v25 = vmax.f32 %v1198_v7, %v1206_v19  ;;  %v5187_v20 = vld [vmem:[#allocation4 + $0x200] sm:$0xff]  }
 0x2fe   : > { %v1209_v26 = vmax.f32 %v1159_v14, %v1205_v22  ;;  %v1211_v27 = vmax.f32 %v1200_v15, %v1207_v23  ;;  %v5188_v21 = vld [vmem:[#allocation4 + $0x280] sm:$0xff]   ;;  %v5189_v23 = vld [vmem:[#allocation4 + $0x248] sm:$0xff]  }
 0x2ff   : > { %v1212_v33 = vpack.c.bf16 %v1208_v24, %v1208_v24  ;;  %v1214_v34 = vpack.c.bf16 %v1210_v25, %v1210_v25  ;;  %v5190_v24 = vld [vmem:[#allocation4 + $0x2c8] sm:$0xff]  }
 0x300   : > { %v1213_v29 = vpack.c.bf16 %v1209_v26, %v1209_v26  ;;  %v1215_v30 = vpack.c.bf16 %v1211_v27, %v1211_v27  ;;  %v5191_v25 = vld [vmem:[#allocation4 + $0x208] sm:$0xff]   ;;  %v5193_v27 = vld [vmem:[#allocation4 + $0x250] sm:$0xff]  }
 0x301   : > { %v5192_v26 = vld [vmem:[#allocation4 + $0x288] sm:$0xff]  }
 0x302   : > { %1513 = vmatprep.mubr.bf16.mxu0 %v1213_v29  ;;  %1553 = vmatprep.mubr.bf16.mxu1 %v1215_v30  ;;  %v5194_v29 = vld [vmem:[#allocation4 + $0x2d0] sm:$0xff]  }
 0x303   : > { %1514 = vmatmul.mubr.bf16.vlgmr.msra.gmra.mrb[12].mxu0 %v1212_v33  ;;  %1554 = vmatmul.mubr.bf16.vlgmr.msra.gmra.mrb[12].mxu1 %v1214_v34  ;;  %v5196_v30 = vld [vmem:[#allocation4 + $0x290] sm:$0xff]   ;;  %v5199_v33 = vld [vmem:[#allocation4 + $0x218] sm:$0xff]  }
 0x304   : > { %1780 = vmatpush1.bf16.msra.mxu0 %v5137_v31  ;;  %1821 = vmatpush1.bf16.msra.mxu1 %v5140_v32  ;;  %v5197_v31 = vld [vmem:[#allocation4 + $0x258] sm:$0xff]  }
 0x305   : > { %1781 = vmatprep.subr.bf16.mxu0 %v5145_v35  ;;  %1822 = vmatprep.subr.bf16.mxu1 %v5148_v36  ;;  %v5198_v32 = vld [vmem:[#allocation4 + $0x2d8] sm:$0xff]   ;;  %v5201_v35 = vld [vmem:[#allocation4 + $0x260] sm:$0xff]  }
 0x306   : > { %1811 = vmatprep.mubr.bf16.mxu0 %v5536_v0  ;;  %1852 = vmatprep.mubr.bf16.mxu1 %v5536_v0  ;;  %v5200_v34 = vld [vmem:[#allocation4 + $0x298] sm:$0xff]   ;;  %v5202_v36 = vld [vmem:[#allocation4 + $0x2e0] sm:$0xff]  }
 0x308   : > { %1782 = vmatpush1.bf16.msra.mxu0 %v5143_v37  ;;  %1823 = vmatpush1.bf16.msra.mxu1 %v5146_v38  ;;  %v5203_v37 = vld [vmem:[#allocation4 + $0x220] sm:$0xff]  }
 0x309   : > { %1783 = vmatprep.subr.bf16.mxu0 %v5151_v39  ;;  %1824 = vmatprep.subr.bf16.mxu1 %v5154_v40  ;;  %v5204_v38 = vld [vmem:[#allocation4 + $0x2a0] sm:$0xff]   ;;  %v5205_v39 = vld [vmem:[#allocation4 + $0x268] sm:$0xff]  }
 0x30a   : > { %v5206_v40 = vld [vmem:[#allocation4 + $0x2e8] sm:$0xff]  }
 0x30c   : > { %1784 = vmatpush1.bf16.msra.mxu0 %v5149_v41  ;;  %1825 = vmatpush1.bf16.msra.mxu1 %v5152_v42  ;;  %v5207_v41 = vld [vmem:[#allocation4 + $0x228] sm:$0xff]  }
 0x30d   : > { %1785 = vmatprep.subr.bf16.mxu0 %v5157_v43  ;;  %1826 = vmatprep.subr.bf16.mxu1 %v5160_v44  ;;  %v5208_v42 = vld [vmem:[#allocation4 + $0x2a8] sm:$0xff]   ;;  %v5209_v43 = vld [vmem:[#allocation4 + $0x270] sm:$0xff]  }
 0x30e   : > { %v5210_v44 = vld [vmem:[#allocation4 + $0x2f0] sm:$0xff]  }
 0x310   : > { %1786 = vmatpush1.bf16.msra.mxu0 %v5155_v45  ;;  %1827 = vmatpush1.bf16.msra.mxu1 %v5158_v46  ;;  %v5211_v45 = vld [vmem:[#allocation4 + $0x230] sm:$0xff]  }
 0x311   : > { %1787 = vmatprep.subr.bf16.mxu0 %v5163_v47  ;;  %1828 = vmatprep.subr.bf16.mxu1 %v5166_v48  ;;  %v5212_v46 = vld [vmem:[#allocation4 + $0x2b0] sm:$0xff]   ;;  %v5213_v47 = vld [vmem:[#allocation4 + $0x278] sm:$0xff]  }
 0x312   : > { %v5214_v48 = vld [vmem:[#allocation4 + $0x2f8] sm:$0xff]  }
 0x314   : > { %1788 = vmatpush1.bf16.msra.mxu0 %v5161_v49  ;;  %1829 = vmatpush1.bf16.msra.mxu1 %v5164_v50  ;;  %v5215_v49 = vld [vmem:[#allocation4 + $0x238] sm:$0xff]  }
 0x315   : > { %1789 = vmatprep.subr.bf16.mxu0 %v5169_v51  ;;  %1830 = vmatprep.subr.bf16.mxu1 %v5172_v52  ;;  %v5216_v50 = vld [vmem:[#allocation4 + $0x2b8] sm:$0xff]   ;;  %v5219_v51 = vld [vmem:[#allocation2 + $0x304] ss:$16 sps:$4 sm:$0xff]  }
 0x316   : > { %v5222_v52 = vld [vmem:[#allocation2 + $0x30c] ss:$16 sps:$4 sm:$0xff]  }
 0x318   : > { %1790 = vmatpush1.bf16.msra.mxu0 %v5167_v53  ;;  %1831 = vmatpush1.bf16.msra.mxu1 %v5170_v54  ;;  %v4409_v53 = vld [vmem:[%s5778_s2 + $0x8] sm:$0xf] }
 0x319   : > { %1791 = vmatprep.subr.bf16.mxu0 %v5175_v55  ;;  %1832 = vmatprep.subr.bf16.mxu1 %v5178_v56  ;;  %v1602_v54 = vrot.slane %v4409_v53, %v5664_v8  ;;  %v1610_v55 = vrot.slane %v4409_v53, %v5666_v9  ;;  %v1606_v56 = vrot.slane %v4409_v53, %v5671_v11 }
 0x31c   : > { %1792 = vmatpush1.bf16.msra.mxu0 %v5173_v57  ;;  %1833 = vmatpush1.bf16.msra.mxu1 %v5176_v58  ;;  %v1614_v57 = vrot.slane %v4409_v53, %v5673_v12  ;;  %v5262_v53 = vld [vmem:[#allocation2 + $0x3e8] ss:$16 sps:$4 sm:$0xff]  }
 0x31d   : > { %1793 = vmatprep.subr.bf16.mxu0 %v5181_v59  ;;  %1834 = vmatprep.subr.bf16.mxu1 %v5184_v60 }
 0x320   : > { %1794 = vmatpush1.bf16.msra.mxu0 %v5179_v61  ;;  %1835 = vmatpush1.bf16.msra.mxu1 %v5182_v62 }
 0x321   : > { %4767 = vmatprep.subr.bf16.mxu0 %v5185_v63  ;;  %4789 = vmatprep.subr.bf16.mxu1 %v5186_v1 }
 0x3d6   : > { %v4739_v2 = vpop.f32.mrb[12].mxu0  ;;  %v4761_v3 = vpop.f32.mrb[12].mxu1 }
 0x3d7   : > { %v4740_v5 = vpop.f32.mrb[13].mxu0  ;;  %v4762_v6 = vpop.f32.mrb[13].mxu1 }
 0x3d8   : > { %v4741_v7 = vadd.f32 %v4740_v5, %v4739_v2  ;;  %v4763_v10 = vadd.f32 %v4762_v6, %v4761_v3  ;;  %v4742_v13 = vpop.f32.mrb[14].mxu0  ;;  %v4764_v14 = vpop.f32.mrb[14].mxu1 }
 0x3d9   : > { %v4743_v15 = vpop.f32.mrb[15].mxu0  ;;  %v4765_v16 = vpop.f32.mrb[15].mxu1 }
 0x3da   : > { %v1516_v17 = vadd.f32 %v4741_v7, %v4376_v4 }
 0x3dc   : > { %v1556_v18 = vadd.f32 %v4763_v10, %v1516_v17 }
 0x3de   : > { %v5702_v19 = vadd.f32 %v1556_v18, %v5685_v28  ;;  %v5195_v28 = vld [vmem:[#allocation4 + $0x210] sm:$0xff]  }
 0x3e0   : > { %v1562_v22 = vpack.c.bf16 %v5702_v19, %v5702_v19 }
 0x3e2   : > { %1812 = vmatmul.mubr.bf16.vlgmr.msra.gmra.mrb[16].mxu0 %v1562_v22  ;;  %1853 = vmatmul.mubr.bf16.vlgmr.msra.gmra.mrb[16].mxu1 %v1562_v22  ;;  %v5217_v22 = vld [vmem:[#allocation2 + $0x300] ss:$16 sps:$4 sm:$0xff]  }
 0x3e3   : > { %4768 = vmatpush3.bf16.msra.mxu0 %v5187_v20  ;;  %4790 = vmatpush3.bf16.msra.mxu1 %v5188_v21 }
 0x3e4   : > { %4769 = vmatprep.subr.bf16.mxu0 %v5189_v23  ;;  %4791 = vmatprep.subr.bf16.mxu1 %v5190_v24  ;;  %v5220_v23 = vld [vmem:[#allocation2 + $0x308] ss:$16 sps:$4 sm:$0xff]  }
 0x3e7   : > { %4770 = vmatpush3.bf16.msra.mxu0 %v5191_v25  ;;  %4792 = vmatpush3.bf16.msra.mxu1 %v5192_v26  ;;  %v5225_v26 = vld [vmem:[#allocation2 + $0x324] ss:$16 sps:$4 sm:$0xff]  }
 0x3e8   : > { %4771 = vmatprep.subr.bf16.mxu0 %v5193_v27  ;;  %4793 = vmatprep.subr.bf16.mxu1 %v5194_v29  ;;  %v5228_v27 = vld [vmem:[#allocation2 + $0x32c] ss:$16 sps:$4 sm:$0xff]   ;;  %v5223_v29 = vld [vmem:[#allocation2 + $0x320] ss:$16 sps:$4 sm:$0xff]  }
 0x3eb   : > { %4772 = vmatpush3.bf16.msra.mxu0 %v5195_v28  ;;  %4794 = vmatpush3.bf16.msra.mxu1 %v5196_v30  ;;  %v5226_v28 = vld [vmem:[#allocation2 + $0x328] ss:$16 sps:$4 sm:$0xff]   ;;  %v5231_v30 = vld [vmem:[#allocation2 + $0x344] ss:$16 sps:$4 sm:$0xff]  }
 0x3ec   : > { %4773 = vmatprep.subr.bf16.mxu0 %v5197_v31  ;;  %4795 = vmatprep.subr.bf16.mxu1 %v5198_v32  ;;  %v5234_v31 = vld [vmem:[#allocation2 + $0x34c] ss:$16 sps:$4 sm:$0xff]   ;;  %v5229_v32 = vld [vmem:[#allocation2 + $0x340] ss:$16 sps:$4 sm:$0xff]  }
 0x3ef   : > { %4774 = vmatpush3.bf16.msra.mxu0 %v5199_v33  ;;  %4796 = vmatpush3.bf16.msra.mxu1 %v5200_v34  ;;  %v5232_v33 = vld [vmem:[#allocation2 + $0x348] ss:$16 sps:$4 sm:$0xff]   ;;  %v5237_v34 = vld [vmem:[#allocation2 + $0x364] ss:$16 sps:$4 sm:$0xff]  }
 0x3f0   : > { %4775 = vmatprep.subr.bf16.mxu0 %v5201_v35  ;;  %4797 = vmatprep.subr.bf16.mxu1 %v5202_v36  ;;  %v5240_v35 = vld [vmem:[#allocation2 + $0x36c] ss:$16 sps:$4 sm:$0xff]   ;;  %v5235_v36 = vld [vmem:[#allocation2 + $0x360] ss:$16 sps:$4 sm:$0xff]  }
 0x3f3   : > { %4776 = vmatpush3.bf16.msra.mxu0 %v5203_v37  ;;  %4798 = vmatpush3.bf16.msra.mxu1 %v5204_v38  ;;  %v5238_v37 = vld [vmem:[#allocation2 + $0x368] ss:$16 sps:$4 sm:$0xff]   ;;  %v5243_v38 = vld [vmem:[#allocation2 + $0x384] ss:$16 sps:$4 sm:$0xff]  }
 0x3f4   : > { %4777 = vmatprep.subr.bf16.mxu0 %v5205_v39  ;;  %4799 = vmatprep.subr.bf16.mxu1 %v5206_v40  ;;  %v5246_v39 = vld [vmem:[#allocation2 + $0x38c] ss:$16 sps:$4 sm:$0xff]   ;;  %v5241_v40 = vld [vmem:[#allocation2 + $0x380] ss:$16 sps:$4 sm:$0xff]  }
 0x3f7   : > { %4778 = vmatpush3.bf16.msra.mxu0 %v5207_v41  ;;  %4800 = vmatpush3.bf16.msra.mxu1 %v5208_v42  ;;  %v5244_v41 = vld [vmem:[#allocation2 + $0x388] ss:$16 sps:$4 sm:$0xff]   ;;  %v5249_v42 = vld [vmem:[#allocation2 + $0x3a4] ss:$16 sps:$4 sm:$0xff]  }
 0x3f8   : > { %4779 = vmatprep.subr.bf16.mxu0 %v5209_v43  ;;  %4801 = vmatprep.subr.bf16.mxu1 %v5210_v44  ;;  %v5252_v43 = vld [vmem:[#allocation2 + $0x3ac] ss:$16 sps:$4 sm:$0xff]   ;;  %v5247_v44 = vld [vmem:[#allocation2 + $0x3a0] ss:$16 sps:$4 sm:$0xff]  }
 0x3fb   : > { %4780 = vmatpush3.bf16.msra.mxu0 %v5211_v45  ;;  %4802 = vmatpush3.bf16.msra.mxu1 %v5212_v46  ;;  %v5250_v45 = vld [vmem:[#allocation2 + $0x3a8] ss:$16 sps:$4 sm:$0xff]   ;;  %v5255_v46 = vld [vmem:[#allocation2 + $0x3c4] ss:$16 sps:$4 sm:$0xff]  }
 0x3fc   : > { %4781 = vmatprep.subr.bf16.mxu0 %v5213_v47  ;;  %4803 = vmatprep.subr.bf16.mxu1 %v5214_v48  ;;  %v5258_v47 = vld [vmem:[#allocation2 + $0x3cc] ss:$16 sps:$4 sm:$0xff]   ;;  %v5253_v48 = vld [vmem:[#allocation2 + $0x3c0] ss:$16 sps:$4 sm:$0xff]  }
 0x3ff   : > { %4782 = vmatpush3.bf16.msra.mxu0 %v5215_v49  ;;  %4804 = vmatpush3.bf16.msra.mxu1 %v5216_v50  ;;  %v5256_v49 = vld [vmem:[#allocation2 + $0x3c8] ss:$16 sps:$4 sm:$0xff]   ;;  %v5261_v50 = vld [vmem:[#allocation2 + $0x3e4] ss:$16 sps:$4 sm:$0xff]  }
 0x400   : > { %2436 = vmatprep.subr.bf16.mxu0 %v5219_v51  ;;  %2477 = vmatprep.subr.bf16.mxu1 %v5222_v52  ;;  %v5264_v51 = vld [vmem:[#allocation2 + $0x3ec] ss:$16 sps:$4 sm:$0xff]   ;;  %v5259_v52 = vld [vmem:[#allocation2 + $0x3e0] ss:$16 sps:$4 sm:$0xff]  }
 0x4b5   : > { %v1813_v58 = vpop.f32.mrb[16].mxu0  ;;  %v1854_v59 = vpop.f32.mrb[16].mxu1 }
 0x4b6   : > { %v1814_v60 = vadd.f32 %v1813_v58, %v1602_v54  ;;  %v1855_v61 = vadd.f32 %v1854_v59, %v1610_v55  ;;  %v1815_v62 = vpop.f32.mrb[17].mxu0  ;;  %v1856_v63 = vpop.f32.mrb[17].mxu1  ;;  %v5265_v54 = vld [vmem:[#allocation4 + $0x340] sm:$0xff]  }
 0x4b7   : > { %v1816_v1 = vadd.f32 %v1815_v62, %v1606_v56  ;;  %v1857_v2 = vadd.f32 %v1856_v63, %v1614_v57  ;;  %v1817_v3 = vpop.f32.mrb[18].mxu0  ;;  %v1858_v4 = vpop.f32.mrb[18].mxu1  ;;  %v5266_v55 = vld [vmem:[#allocation4 + $0x3c0] sm:$0xff]  }
 0x4b8   : > { %v1861_v5 = vmul.f32 0.2, %v1814_v60  ;;  %v1863_v6 = vmul.f32 0.2, %v1855_v61  ;;  %v1818_v7 = vpop.f32.mrb[19].mxu0  ;;  %v1859_v10 = vpop.f32.mrb[19].mxu1 }
 0x4b9   : > { %v1862_v13 = vmul.f32 0.2, %v1816_v1  ;;  %v1864_v14 = vmul.f32 0.2, %v1857_v2  ;;  %v4443_v58 = vld [vmem:[%s5780_s4 + $0x2] ss:$0 sm:$0xff] }
 0x4ba   : > { %v1865_v15 = vmax.f32 %v1814_v60, %v1861_v5  ;;  %v1867_v16 = vmax.f32 %v1855_v61, %v1863_v6  ;;  %v5267_v7 = vld [vmem:[#allocation4 + $0x300] sm:$0xff]  }
 0x4bb   : > { %v1866_v17 = vmax.f32 %v1816_v1, %v1862_v13  ;;  %v1868_v18 = vmax.f32 %v1857_v2, %v1864_v14  ;;  %v5268_v10 = vld [vmem:[#allocation4 + $0x380] sm:$0xff]   ;;  %v5269_v14 = vld [vmem:[#allocation4 + $0x348] sm:$0xff]  }
 0x4bc   : > { %v1869_v24 = vpack.c.bf16 %v1865_v15, %v1865_v15  ;;  %v1871_v25 = vpack.c.bf16 %v1867_v16, %v1867_v16  ;;  %v5270_v15 = vld [vmem:[#allocation4 + $0x3c8] sm:$0xff]  }
 0x4bd   : > { %v1870_v20 = vpack.c.bf16 %v1866_v17, %v1866_v17  ;;  %v1872_v21 = vpack.c.bf16 %v1868_v18, %v1868_v18  ;;  %v5271_v16 = vld [vmem:[#allocation4 + $0x308] sm:$0xff]   ;;  %v5273_v18 = vld [vmem:[#allocation4 + $0x350] sm:$0xff]  }
 0x4be   : > { %v5272_v17 = vld [vmem:[#allocation4 + $0x388] sm:$0xff]  }
 0x4bf   : > { %2170 = vmatprep.mubr.bf16.mxu0 %v1870_v20  ;;  %2210 = vmatprep.mubr.bf16.mxu1 %v1872_v21  ;;  %v5274_v20 = vld [vmem:[#allocation4 + $0x3d0] sm:$0xff]  }
 0x4c0   : > { %2171 = vmatmul.mubr.bf16.vlgmr.msra.gmra.mrb[20].mxu0 %v1869_v24  ;;  %2211 = vmatmul.mubr.bf16.vlgmr.msra.gmra.mrb[20].mxu1 %v1871_v25  ;;  %v5276_v21 = vld [vmem:[#allocation4 + $0x390] sm:$0xff]   ;;  %v5279_v24 = vld [vmem:[#allocation4 + $0x318] sm:$0xff]  }
 0x4c1   : > { %2437 = vmatpush1.bf16.msra.mxu0 %v5217_v22  ;;  %2478 = vmatpush1.bf16.msra.mxu1 %v5220_v23  ;;  %v5277_v22 = vld [vmem:[#allocation4 + $0x358] sm:$0xff]  }
 0x4c2   : > { %2438 = vmatprep.subr.bf16.mxu0 %v5225_v26  ;;  %2479 = vmatprep.subr.bf16.mxu1 %v5228_v27  ;;  %v5278_v23 = vld [vmem:[#allocation4 + $0x3d8] sm:$0xff]   ;;  %v5281_v26 = vld [vmem:[#allocation4 + $0x360] sm:$0xff]  }
 0x4c3   : > { %2468 = vmatprep.mubr.bf16.mxu0 %v5536_v0  ;;  %2509 = vmatprep.mubr.bf16.mxu1 %v5536_v0  ;;  %v5280_v25 = vld [vmem:[#allocation4 + $0x398] sm:$0xff]   ;;  %v5282_v27 = vld [vmem:[#allocation4 + $0x3e0] sm:$0xff]  }
 0x4c5   : > { %2439 = vmatpush1.bf16.msra.mxu0 %v5223_v29  ;;  %2480 = vmatpush1.bf16.msra.mxu1 %v5226_v28  ;;  %v5283_v29 = vld [vmem:[#allocation4 + $0x320] sm:$0xff]  }
 0x4c6   : > { %2440 = vmatprep.subr.bf16.mxu0 %v5231_v30  ;;  %2481 = vmatprep.subr.bf16.mxu1 %v5234_v31  ;;  %v5284_v28 = vld [vmem:[#allocation4 + $0x3a0] sm:$0xff]   ;;  %v5285_v30 = vld [vmem:[#allocation4 + $0x368] sm:$0xff]  }
 0x4c7   : > { %v5286_v31 = vld [vmem:[#allocation4 + $0x3e8] sm:$0xff]  }
 0x4c9   : > { %2441 = vmatpush1.bf16.msra.mxu0 %v5229_v32  ;;  %2482 = vmatpush1.bf16.msra.mxu1 %v5232_v33  ;;  %v5287_v32 = vld [vmem:[#allocation4 + $0x328] sm:$0xff]  }
 0x4ca   : > { %2442 = vmatprep.subr.bf16.mxu0 %v5237_v34  ;;  %2483 = vmatprep.subr.bf16.mxu1 %v5240_v35  ;;  %v5288_v33 = vld [vmem:[#allocation4 + $0x3a8] sm:$0xff]   ;;  %v5289_v34 = vld [vmem:[#allocation4 + $0x370] sm:$0xff]  }
 0x4cb   : > { %v5290_v35 = vld [vmem:[#allocation4 + $0x3f0] sm:$0xff]  }
 0x4cd   : > { %2443 = vmatpush1.bf16.msra.mxu0 %v5235_v36  ;;  %2484 = vmatpush1.bf16.msra.mxu1 %v5238_v37  ;;  %v5291_v36 = vld [vmem:[#allocation4 + $0x330] sm:$0xff]  }
 0x4ce   : > { %2444 = vmatprep.subr.bf16.mxu0 %v5243_v38  ;;  %2485 = vmatprep.subr.bf16.mxu1 %v5246_v39  ;;  %v5292_v37 = vld [vmem:[#allocation4 + $0x3b0] sm:$0xff]   ;;  %v5293_v38 = vld [vmem:[#allocation4 + $0x378] sm:$0xff]  }
 0x4cf   : > { %v5294_v39 = vld [vmem:[#allocation4 + $0x3f8] sm:$0xff]  }
 0x4d1   : > { %2445 = vmatpush1.bf16.msra.mxu0 %v5241_v40  ;;  %2486 = vmatpush1.bf16.msra.mxu1 %v5244_v41  ;;  %v5295_v40 = vld [vmem:[#allocation4 + $0x338] sm:$0xff]  }
 0x4d2   : > { %2446 = vmatprep.subr.bf16.mxu0 %v5249_v42  ;;  %2487 = vmatprep.subr.bf16.mxu1 %v5252_v43  ;;  %v5296_v41 = vld [vmem:[#allocation4 + $0x3b8] sm:$0xff]   ;;  %v5299_v42 = vld [vmem:[#allocation2 + $0x404] ss:$16 sps:$4 sm:$0xff]  }
 0x4d3   : > { %v5302_v43 = vld [vmem:[#allocation2 + $0x40c] ss:$16 sps:$4 sm:$0xff]  }
 0x4d5   : > { %2447 = vmatpush1.bf16.msra.mxu0 %v5247_v44  ;;  %2488 = vmatpush1.bf16.msra.mxu1 %v5250_v45  ;;  %v4476_v44 = vld [vmem:[%s5778_s2 + $0xc] sm:$0xf] }
 0x4d6   : > { %2448 = vmatprep.subr.bf16.mxu0 %v5255_v46  ;;  %2489 = vmatprep.subr.bf16.mxu1 %v5258_v47  ;;  %v2259_v45 = vrot.slane %v4476_v44, %v5664_v8  ;;  %v2267_v46 = vrot.slane %v4476_v44, %v5666_v9  ;;  %v2263_v47 = vrot.slane %v4476_v44, %v5671_v11 }
 0x4d9   : > { %2449 = vmatpush1.bf16.msra.mxu0 %v5253_v48  ;;  %2490 = vmatpush1.bf16.msra.mxu1 %v5256_v49  ;;  %v2271_v48 = vrot.slane %v4476_v44, %v5673_v12  ;;  %v5342_v44 = vld [vmem:[#allocation2 + $0x4e8] ss:$16 sps:$4 sm:$0xff]  }
 0x4da   : > { %2450 = vmatprep.subr.bf16.mxu0 %v5261_v50  ;;  %2491 = vmatprep.subr.bf16.mxu1 %v5264_v51 }
 0x4dd   : > { %2451 = vmatpush1.bf16.msra.mxu0 %v5259_v52  ;;  %2492 = vmatpush1.bf16.msra.mxu1 %v5262_v53 }
 0x4de   : > { %4811 = vmatprep.subr.bf16.mxu0 %v5265_v54  ;;  %4833 = vmatprep.subr.bf16.mxu1 %v5266_v55 }
 0x593   : > { %v4783_v56 = vpop.f32.mrb[20].mxu0  ;;  %v4805_v57 = vpop.f32.mrb[20].mxu1 }
 0x594   : > { %v4784_v59 = vpop.f32.mrb[21].mxu0  ;;  %v4806_v60 = vpop.f32.mrb[21].mxu1 }
 0x595   : > { %v4785_v61 = vadd.f32 %v4784_v59, %v4783_v56  ;;  %v4807_v62 = vadd.f32 %v4806_v60, %v4805_v57  ;;  %v4786_v63 = vpop.f32.mrb[22].mxu0  ;;  %v4808_v1 = vpop.f32.mrb[22].mxu1 }
 0x596   : > { %v4787_v2 = vpop.f32.mrb[23].mxu0  ;;  %v4809_v3 = vpop.f32.mrb[23].mxu1 }
 0x597   : > { %v2173_v4 = vadd.f32 %v4785_v61, %v4443_v58 }
 0x599   : > { %v2213_v5 = vadd.f32 %v4807_v62, %v2173_v4 }
 0x59b   : > { %v5719_v6 = vadd.f32 %v2213_v5, %v5702_v19  ;;  %v5275_v19 = vld [vmem:[#allocation4 + $0x310] sm:$0xff]  }
 0x59d   : > { %v2219_v13 = vpack.c.bf16 %v5719_v6, %v5719_v6 }
 0x59f   : > { %2469 = vmatmul.mubr.bf16.vlgmr.msra.gmra.mrb[24].mxu0 %v2219_v13  ;;  %2510 = vmatmul.mubr.bf16.vlgmr.msra.gmra.mrb[24].mxu1 %v2219_v13  ;;  %v5297_v13 = vld [vmem:[#allocation2 + $0x400] ss:$16 sps:$4 sm:$0xff]  }
 0x5a0   : > { %4812 = vmatpush3.bf16.msra.mxu0 %v5267_v7  ;;  %4834 = vmatpush3.bf16.msra.mxu1 %v5268_v10 }
 0x5a1   : > { %4813 = vmatprep.subr.bf16.mxu0 %v5269_v14  ;;  %4835 = vmatprep.subr.bf16.mxu1 %v5270_v15  ;;  %v5300_v14 = vld [vmem:[#allocation2 + $0x408] ss:$16 sps:$4 sm:$0xff]  }
 0x5a4   : > { %4814 = vmatpush3.bf16.msra.mxu0 %v5271_v16  ;;  %4836 = vmatpush3.bf16.msra.mxu1 %v5272_v17  ;;  %v5305_v17 = vld [vmem:[#allocation2 + $0x424] ss:$16 sps:$4 sm:$0xff]  }
 0x5a5   : > { %4815 = vmatprep.subr.bf16.mxu0 %v5273_v18  ;;  %4837 = vmatprep.subr.bf16.mxu1 %v5274_v20  ;;  %v5308_v18 = vld [vmem:[#allocation2 + $0x42c] ss:$16 sps:$4 sm:$0xff]   ;;  %v5303_v20 = vld [vmem:[#allocation2 + $0x420] ss:$16 sps:$4 sm:$0xff]  }
 0x5a8   : > { %4816 = vmatpush3.bf16.msra.mxu0 %v5275_v19  ;;  %4838 = vmatpush3.bf16.msra.mxu1 %v5276_v21  ;;  %v5306_v19 = vld [vmem:[#allocation2 + $0x428] ss:$16 sps:$4 sm:$0xff]   ;;  %v5311_v21 = vld [vmem:[#allocation2 + $0x444] ss:$16 sps:$4 sm:$0xff]  }
 0x5a9   : > { %4817 = vmatprep.subr.bf16.mxu0 %v5277_v22  ;;  %4839 = vmatprep.subr.bf16.mxu1 %v5278_v23  ;;  %v5314_v22 = vld [vmem:[#allocation2 + $0x44c] ss:$16 sps:$4 sm:$0xff]   ;;  %v5309_v23 = vld [vmem:[#allocation2 + $0x440] ss:$16 sps:$4 sm:$0xff]  }
 0x5ac   : > { %4818 = vmatpush3.bf16.msra.mxu0 %v5279_v24  ;;  %4840 = vmatpush3.bf16.msra.mxu1 %v5280_v25  ;;  %v5312_v24 = vld [vmem:[#allocation2 + $0x448] ss:$16 sps:$4 sm:$0xff]   ;;  %v5317_v25 = vld [vmem:[#allocation2 + $0x464] ss:$16 sps:$4 sm:$0xff]  }
 0x5ad   : > { %4819 = vmatprep.subr.bf16.mxu0 %v5281_v26  ;;  %4841 = vmatprep.subr.bf16.mxu1 %v5282_v27  ;;  %v5320_v26 = vld [vmem:[#allocation2 + $0x46c] ss:$16 sps:$4 sm:$0xff]   ;;  %v5315_v27 = vld [vmem:[#allocation2 + $0x460] ss:$16 sps:$4 sm:$0xff]  }
 0x5b0   : > { %4820 = vmatpush3.bf16.msra.mxu0 %v5283_v29  ;;  %4842 = vmatpush3.bf16.msra.mxu1 %v5284_v28  ;;  %v5318_v29 = vld [vmem:[#allocation2 + $0x468] ss:$16 sps:$4 sm:$0xff]   ;;  %v5323_v28 = vld [vmem:[#allocation2 + $0x484] ss:$16 sps:$4 sm:$0xff]  }
 0x5b1   : > { %4821 = vmatprep.subr.bf16.mxu0 %v5285_v30  ;;  %4843 = vmatprep.subr.bf16.mxu1 %v5286_v31  ;;  %v5326_v30 = vld [vmem:[#allocation2 + $0x48c] ss:$16 sps:$4 sm:$0xff]   ;;  %v5321_v31 = vld [vmem:[#allocation2 + $0x480] ss:$16 sps:$4 sm:$0xff]  }
 0x5b4   : > { %4822 = vmatpush3.bf16.msra.mxu0 %v5287_v32  ;;  %4844 = vmatpush3.bf16.msra.mxu1 %v5288_v33  ;;  %v5324_v32 = vld [vmem:[#allocation2 + $0x488] ss:$16 sps:$4 sm:$0xff]   ;;  %v5329_v33 = vld [vmem:[#allocation2 + $0x4a4] ss:$16 sps:$4 sm:$0xff]  }
 0x5b5   : > { %4823 = vmatprep.subr.bf16.mxu0 %v5289_v34  ;;  %4845 = vmatprep.subr.bf16.mxu1 %v5290_v35  ;;  %v5332_v34 = vld [vmem:[#allocation2 + $0x4ac] ss:$16 sps:$4 sm:$0xff]   ;;  %v5327_v35 = vld [vmem:[#allocation2 + $0x4a0] ss:$16 sps:$4 sm:$0xff]  }
 0x5b8   : > { %4824 = vmatpush3.bf16.msra.mxu0 %v5291_v36  ;;  %4846 = vmatpush3.bf16.msra.mxu1 %v5292_v37  ;;  %v5330_v36 = vld [vmem:[#allocation2 + $0x4a8] ss:$16 sps:$4 sm:$0xff]   ;;  %v5335_v37 = vld [vmem:[#allocation2 + $0x4c4] ss:$16 sps:$4 sm:$0xff]  }
 0x5b9   : > { %4825 = vmatprep.subr.bf16.mxu0 %v5293_v38  ;;  %4847 = vmatprep.subr.bf16.mxu1 %v5294_v39  ;;  %v5338_v38 = vld [vmem:[#allocation2 + $0x4cc] ss:$16 sps:$4 sm:$0xff]   ;;  %v5333_v39 = vld [vmem:[#allocation2 + $0x4c0] ss:$16 sps:$4 sm:$0xff]  }
 0x5bc   : > { %4826 = vmatpush3.bf16.msra.mxu0 %v5295_v40  ;;  %4848 = vmatpush3.bf16.msra.mxu1 %v5296_v41  ;;  %v5336_v40 = vld [vmem:[#allocation2 + $0x4c8] ss:$16 sps:$4 sm:$0xff]   ;;  %v5341_v41 = vld [vmem:[#allocation2 + $0x4e4] ss:$16 sps:$4 sm:$0xff]  }
 0x5bd   : > { %3093 = vmatprep.subr.bf16.mxu0 %v5299_v42  ;;  %3134 = vmatprep.subr.bf16.mxu1 %v5302_v43  ;;  %v5344_v42 = vld [vmem:[#allocation2 + $0x4ec] ss:$16 sps:$4 sm:$0xff]   ;;  %v5339_v43 = vld [vmem:[#allocation2 + $0x4e0] ss:$16 sps:$4 sm:$0xff]  }
 0x672   : > { %v2470_v49 = vpop.f32.mrb[24].mxu0  ;;  %v2511_v50 = vpop.f32.mrb[24].mxu1 }
 0x673   : > { %v2471_v51 = vadd.f32 %v2470_v49, %v2259_v45  ;;  %v2512_v52 = vadd.f32 %v2511_v50, %v2267_v46  ;;  %v2472_v53 = vpop.f32.mrb[25].mxu0  ;;  %v2513_v54 = vpop.f32.mrb[25].mxu1  ;;  %v5345_v45 = vld [vmem:[#allocation4 + $0x440] sm:$0xff]  }
 0x674   : > { %v2473_v55 = vadd.f32 %v2472_v53, %v2263_v47  ;;  %v2514_v56 = vadd.f32 %v2513_v54, %v2271_v48  ;;  %v2474_v57 = vpop.f32.mrb[26].mxu0  ;;  %v2515_v58 = vpop.f32.mrb[26].mxu1  ;;  %v5346_v46 = vld [vmem:[#allocation4 + $0x4c0] sm:$0xff]  }
 0x675   : > { %v2518_v59 = vmul.f32 0.2, %v2471_v51  ;;  %v2520_v60 = vmul.f32 0.2, %v2512_v52  ;;  %v2475_v61 = vpop.f32.mrb[27].mxu0  ;;  %v2516_v62 = vpop.f32.mrb[27].mxu1 }
 0x676   : > { %v2519_v63 = vmul.f32 0.2, %v2473_v55  ;;  %v2521_v1 = vmul.f32 0.2, %v2514_v56  ;;  %v4510_v49 = vld [vmem:[%s5780_s4 + $0x3] ss:$0 sm:$0xff] }
 0x677   : > { %v2522_v2 = vmax.f32 %v2471_v51, %v2518_v59  ;;  %v2524_v3 = vmax.f32 %v2512_v52, %v2520_v60  ;;  %v5347_v61 = vld [vmem:[#allocation4 + $0x400] sm:$0xff]  }
 0x678   : > { %v2523_v4 = vmax.f32 %v2473_v55, %v2519_v63  ;;  %v2525_v5 = vmax.f32 %v2514_v56, %v2521_v1  ;;  %v5348_v62 = vld [vmem:[#allocation4 + $0x480] sm:$0xff]   ;;  %v5349_v1 = vld [vmem:[#allocation4 + $0x448] sm:$0xff]  }
 0x679   : > { %v2526_v15 = vpack.c.bf16 %v2522_v2, %v2522_v2  ;;  %v2528_v16 = vpack.c.bf16 %v2524_v3, %v2524_v3  ;;  %v5350_v2 = vld [vmem:[#allocation4 + $0x4c8] sm:$0xff]  }
 0x67a   : > { %v2527_v7 = vpack.c.bf16 %v2523_v4, %v2523_v4  ;;  %v2529_v10 = vpack.c.bf16 %v2525_v5, %v2525_v5  ;;  %v5351_v3 = vld [vmem:[#allocation4 + $0x408] sm:$0xff]   ;;  %v5353_v5 = vld [vmem:[#allocation4 + $0x450] sm:$0xff]  }
 0x67b   : > { %v5352_v4 = vld [vmem:[#allocation4 + $0x488] sm:$0xff]  }
 0x67c   : > { %2827 = vmatprep.mubr.bf16.mxu0 %v2527_v7  ;;  %2867 = vmatprep.mubr.bf16.mxu1 %v2529_v10  ;;  %v5354_v7 = vld [vmem:[#allocation4 + $0x4d0] sm:$0xff]  }
 0x67d   : > { %2828 = vmatmul.mubr.bf16.vlgmr.msra.gmra.mrb[28].mxu0 %v2526_v15  ;;  %2868 = vmatmul.mubr.bf16.vlgmr.msra.gmra.mrb[28].mxu1 %v2528_v16  ;;  %v5356_v10 = vld [vmem:[#allocation4 + $0x490] sm:$0xff]   ;;  %v5359_v15 = vld [vmem:[#allocation4 + $0x418] sm:$0xff]  }
 0x67e   : > { %3094 = vmatpush1.bf16.msra.mxu0 %v5297_v13  ;;  %3135 = vmatpush1.bf16.msra.mxu1 %v5300_v14  ;;  %v5357_v13 = vld [vmem:[#allocation4 + $0x458] sm:$0xff]  }
 0x67f   : > { %3095 = vmatprep.subr.bf16.mxu0 %v5305_v17  ;;  %3136 = vmatprep.subr.bf16.mxu1 %v5308_v18  ;;  %v5358_v14 = vld [vmem:[#allocation4 + $0x4d8] sm:$0xff]   ;;  %v5361_v17 = vld [vmem:[#allocation4 + $0x460] sm:$0xff]  }
 0x680   : > { %3125 = vmatprep.mubr.bf16.mxu0 %v5536_v0  ;;  %3166 = vmatprep.mubr.bf16.mxu1 %v5536_v0  ;;  %v5360_v16 = vld [vmem:[#allocation4 + $0x498] sm:$0xff]   ;;  %v5362_v18 = vld [vmem:[#allocation4 + $0x4e0] sm:$0xff]  }
 0x682   : > { %3096 = vmatpush1.bf16.msra.mxu0 %v5303_v20  ;;  %3137 = vmatpush1.bf16.msra.mxu1 %v5306_v19  ;;  %v5363_v20 = vld [vmem:[#allocation4 + $0x420] sm:$0xff]  }
 0x683   : > { %3097 = vmatprep.subr.bf16.mxu0 %v5311_v21  ;;  %3138 = vmatprep.subr.bf16.mxu1 %v5314_v22  ;;  %v5364_v19 = vld [vmem:[#allocation4 + $0x4a0] sm:$0xff]   ;;  %v5365_v21 = vld [vmem:[#allocation4 + $0x468] sm:$0xff]  }
 0x684   : > { %v5366_v22 = vld [vmem:[#allocation4 + $0x4e8] sm:$0xff]  }
 0x686   : > { %3098 = vmatpush1.bf16.msra.mxu0 %v5309_v23  ;;  %3139 = vmatpush1.bf16.msra.mxu1 %v5312_v24  ;;  %v5367_v23 = vld [vmem:[#allocation4 + $0x428] sm:$0xff]  }
 0x687   : > { %3099 = vmatprep.subr.bf16.mxu0 %v5317_v25  ;;  %3140 = vmatprep.subr.bf16.mxu1 %v5320_v26  ;;  %v5368_v24 = vld [vmem:[#allocation4 + $0x4a8] sm:$0xff]   ;;  %v5369_v25 = vld [vmem:[#allocation4 + $0x470] sm:$0xff]  }
 0x688   : > { %v5370_v26 = vld [vmem:[#allocation4 + $0x4f0] sm:$0xff]  }
 0x68a   : > { %3100 = vmatpush1.bf16.msra.mxu0 %v5315_v27  ;;  %3141 = vmatpush1.bf16.msra.mxu1 %v5318_v29  ;;  %v5371_v27 = vld [vmem:[#allocation4 + $0x430] sm:$0xff]  }
 0x68b   : > { %3101 = vmatprep.subr.bf16.mxu0 %v5323_v28  ;;  %3142 = vmatprep.subr.bf16.mxu1 %v5326_v30  ;;  %v5372_v29 = vld [vmem:[#allocation4 + $0x4b0] sm:$0xff]   ;;  %v5373_v28 = vld [vmem:[#allocation4 + $0x478] sm:$0xff]  }
 0x68c   : > { %v5374_v30 = vld [vmem:[#allocation4 + $0x4f8] sm:$0xff]  }
 0x68e   : > { %3102 = vmatpush1.bf16.msra.mxu0 %v5321_v31  ;;  %3143 = vmatpush1.bf16.msra.mxu1 %v5324_v32  ;;  %v5375_v31 = vld [vmem:[#allocation4 + $0x438] sm:$0xff]  }
 0x68f   : > { %3103 = vmatprep.subr.bf16.mxu0 %v5329_v33  ;;  %3144 = vmatprep.subr.bf16.mxu1 %v5332_v34  ;;  %v5376_v32 = vld [vmem:[#allocation4 + $0x4b8] sm:$0xff]   ;;  %v5379_v33 = vld [vmem:[#allocation2 + $0x504] ss:$16 sps:$4 sm:$0xff]  }
 0x690   : > { %v5382_v34 = vld [vmem:[#allocation2 + $0x50c] ss:$16 sps:$4 sm:$0xff]  }
 0x692   : > { %3104 = vmatpush1.bf16.msra.mxu0 %v5327_v35  ;;  %3145 = vmatpush1.bf16.msra.mxu1 %v5330_v36  ;;  %v4543_v35 = vld [vmem:[%s5778_s2 + $0x10] sm:$0xf] }
 0x693   : > { %3105 = vmatprep.subr.bf16.mxu0 %v5335_v37  ;;  %3146 = vmatprep.subr.bf16.mxu1 %v5338_v38  ;;  %v2916_v36 = vrot.slane %v4543_v35, %v5664_v8  ;;  %v2924_v37 = vrot.slane %v4543_v35, %v5666_v9  ;;  %v2920_v38 = vrot.slane %v4543_v35, %v5671_v11 }
 0x696   : > { %3106 = vmatpush1.bf16.msra.mxu0 %v5333_v39  ;;  %3147 = vmatpush1.bf16.msra.mxu1 %v5336_v40  ;;  %v2928_v39 = vrot.slane %v4543_v35, %v5673_v12  ;;  %v5425_v35 = vld [vmem:[#allocation4 + $0x540] sm:$0xff]  }
 0x697   : > { %3107 = vmatprep.subr.bf16.mxu0 %v5341_v41  ;;  %3148 = vmatprep.subr.bf16.mxu1 %v5344_v42 }
 0x69a   : > { %3108 = vmatpush1.bf16.msra.mxu0 %v5339_v43  ;;  %3149 = vmatpush1.bf16.msra.mxu1 %v5342_v44 }
 0x69b   : > { %4855 = vmatprep.subr.bf16.mxu0 %v5345_v45  ;;  %4877 = vmatprep.subr.bf16.mxu1 %v5346_v46 }
 0x750   : > { %v4827_v47 = vpop.f32.mrb[28].mxu0  ;;  %v4849_v48 = vpop.f32.mrb[28].mxu1 }
 0x751   : > { %v4828_v50 = vpop.f32.mrb[29].mxu0  ;;  %v4850_v51 = vpop.f32.mrb[29].mxu1 }
 0x752   : > { %v4829_v52 = vadd.f32 %v4828_v50, %v4827_v47  ;;  %v4851_v53 = vadd.f32 %v4850_v51, %v4849_v48  ;;  %v4830_v54 = vpop.f32.mrb[30].mxu0  ;;  %v4852_v55 = vpop.f32.mrb[30].mxu1 }
 0x753   : > { %v4831_v56 = vpop.f32.mrb[31].mxu0  ;;  %v4853_v57 = vpop.f32.mrb[31].mxu1 }
 0x754   : > { %v2830_v58 = vadd.f32 %v4829_v52, %v4510_v49 }
 0x756   : > { %v2870_v59 = vadd.f32 %v4851_v53, %v2830_v58 }
 0x758   : > { %v5736_v60 = vadd.f32 %v2870_v59, %v5719_v6  ;;  %v5355_v6 = vld [vmem:[#allocation4 + $0x410] sm:$0xff]  }
 0x75a   : > { %v2876_v63 = vpack.c.bf16 %v5736_v60, %v5736_v60 }
 0x75c   : > { %3126 = vmatmul.mubr.bf16.vlgmr.msra.gmra.mrb[32].mxu0 %v2876_v63  ;;  %3167 = vmatmul.mubr.bf16.vlgmr.msra.gmra.mrb[32].mxu1 %v2876_v63  ;;  %v5377_v63 = vld [vmem:[#allocation2 + $0x500] ss:$16 sps:$4 sm:$0xff]  }
 0x75d   : > { %4856 = vmatpush3.bf16.msra.mxu0 %v5347_v61  ;;  %4878 = vmatpush3.bf16.msra.mxu1 %v5348_v62 }
 0x75e   : > { %4857 = vmatprep.subr.bf16.mxu0 %v5349_v1  ;;  %4879 = vmatprep.subr.bf16.mxu1 %v5350_v2  ;;  %v5380_v1 = vld [vmem:[#allocation2 + $0x508] ss:$16 sps:$4 sm:$0xff]  }
 0x761   : > { %4858 = vmatpush3.bf16.msra.mxu0 %v5351_v3  ;;  %4880 = vmatpush3.bf16.msra.mxu1 %v5352_v4  ;;  %v5385_v4 = vld [vmem:[#allocation2 + $0x524] ss:$16 sps:$4 sm:$0xff]  }
 0x762   : > { %4859 = vmatprep.subr.bf16.mxu0 %v5353_v5  ;;  %4881 = vmatprep.subr.bf16.mxu1 %v5354_v7  ;;  %v5388_v5 = vld [vmem:[#allocation2 + $0x52c] ss:$16 sps:$4 sm:$0xff]   ;;  %v5383_v7 = vld [vmem:[#allocation2 + $0x520] ss:$16 sps:$4 sm:$0xff]  }
 0x765   : > { %4860 = vmatpush3.bf16.msra.mxu0 %v5355_v6  ;;  %4882 = vmatpush3.bf16.msra.mxu1 %v5356_v10  ;;  %v5386_v6 = vld [vmem:[#allocation2 + $0x528] ss:$16 sps:$4 sm:$0xff]   ;;  %v5391_v10 = vld [vmem:[#allocation2 + $0x544] ss:$16 sps:$4 sm:$0xff]  }
 0x766   : > { %4861 = vmatprep.subr.bf16.mxu0 %v5357_v13  ;;  %4883 = vmatprep.subr.bf16.mxu1 %v5358_v14  ;;  %v5394_v13 = vld [vmem:[#allocation2 + $0x54c] ss:$16 sps:$4 sm:$0xff]   ;;  %v5389_v14 = vld [vmem:[#allocation2 + $0x540] ss:$16 sps:$4 sm:$0xff]  }
 0x769   : > { %4862 = vmatpush3.bf16.msra.mxu0 %v5359_v15  ;;  %4884 = vmatpush3.bf16.msra.mxu1 %v5360_v16  ;;  %v5392_v15 = vld [vmem:[#allocation2 + $0x548] ss:$16 sps:$4 sm:$0xff]   ;;  %v5397_v16 = vld [vmem:[#allocation2 + $0x564] ss:$16 sps:$4 sm:$0xff]  }
 0x76a   : > { %4863 = vmatprep.subr.bf16.mxu0 %v5361_v17  ;;  %4885 = vmatprep.subr.bf16.mxu1 %v5362_v18  ;;  %v5400_v17 = vld [vmem:[#allocation2 + $0x56c] ss:$16 sps:$4 sm:$0xff]   ;;  %v5395_v18 = vld [vmem:[#allocation2 + $0x560] ss:$16 sps:$4 sm:$0xff]  }
 0x76d   : > { %4864 = vmatpush3.bf16.msra.mxu0 %v5363_v20  ;;  %4886 = vmatpush3.bf16.msra.mxu1 %v5364_v19  ;;  %v5398_v20 = vld [vmem:[#allocation2 + $0x568] ss:$16 sps:$4 sm:$0xff]   ;;  %v5403_v19 = vld [vmem:[#allocation2 + $0x584] ss:$16 sps:$4 sm:$0xff]  }
 0x76e   : > { %4865 = vmatprep.subr.bf16.mxu0 %v5365_v21  ;;  %4887 = vmatprep.subr.bf16.mxu1 %v5366_v22  ;;  %v5406_v21 = vld [vmem:[#allocation2 + $0x58c] ss:$16 sps:$4 sm:$0xff]   ;;  %v5401_v22 = vld [vmem:[#allocation2 + $0x580] ss:$16 sps:$4 sm:$0xff]  }
 0x771   : > { %4866 = vmatpush3.bf16.msra.mxu0 %v5367_v23  ;;  %4888 = vmatpush3.bf16.msra.mxu1 %v5368_v24  ;;  %v5409_v23 = vld [vmem:[#allocation2 + $0x5a4] ss:$16 sps:$4 sm:$0xff]   ;;  %v5412_v24 = vld [vmem:[#allocation2 + $0x5ac] ss:$16 sps:$4 sm:$0xff]  }
 0x772   : > { %4867 = vmatprep.subr.bf16.mxu0 %v5369_v25  ;;  %4889 = vmatprep.subr.bf16.mxu1 %v5370_v26  ;;  %v5407_v25 = vld [vmem:[#allocation2 + $0x5a0] ss:$16 sps:$4 sm:$0xff]   ;;  %v5410_v26 = vld [vmem:[#allocation2 + $0x5a8] ss:$16 sps:$4 sm:$0xff]  }
 0x775   : > { %4868 = vmatpush3.bf16.msra.mxu0 %v5371_v27  ;;  %4890 = vmatpush3.bf16.msra.mxu1 %v5372_v29  ;;  %v5415_v27 = vld [vmem:[#allocation2 + $0x5c4] ss:$16 sps:$4 sm:$0xff]   ;;  %v5418_v29 = vld [vmem:[#allocation2 + $0x5cc] ss:$16 sps:$4 sm:$0xff]  }
 0x776   : > { %4869 = vmatprep.subr.bf16.mxu0 %v5373_v28  ;;  %4891 = vmatprep.subr.bf16.mxu1 %v5374_v30  ;;  %v5413_v28 = vld [vmem:[#allocation2 + $0x5c0] ss:$16 sps:$4 sm:$0xff]   ;;  %v5416_v30 = vld [vmem:[#allocation2 + $0x5c8] ss:$16 sps:$4 sm:$0xff]  }
 0x779   : > { %4870 = vmatpush3.bf16.msra.mxu0 %v5375_v31  ;;  %4892 = vmatpush3.bf16.msra.mxu1 %v5376_v32  ;;  %v5421_v31 = vld [vmem:[#allocation2 + $0x5e4] ss:$16 sps:$4 sm:$0xff]   ;;  %v5424_v32 = vld [vmem:[#allocation2 + $0x5ec] ss:$16 sps:$4 sm:$0xff]  }
 0x77a   : > { %3750 = vmatprep.subr.bf16.mxu0 %v5379_v33  ;;  %3791 = vmatprep.subr.bf16.mxu1 %v5382_v34  ;;  %v5419_v33 = vld [vmem:[#allocation2 + $0x5e0] ss:$16 sps:$4 sm:$0xff]   ;;  %v5422_v34 = vld [vmem:[#allocation2 + $0x5e8] ss:$16 sps:$4 sm:$0xff]  }
 0x82f   : > { %v3127_v40 = vpop.f32.mrb[32].mxu0  ;;  %v3168_v41 = vpop.f32.mrb[32].mxu1 }
 0x830   : > { %v3128_v42 = vadd.f32 %v3127_v40, %v2916_v36  ;;  %v3169_v43 = vadd.f32 %v3168_v41, %v2924_v37  ;;  %v3129_v44 = vpop.f32.mrb[33].mxu0  ;;  %v3170_v45 = vpop.f32.mrb[33].mxu1  ;;  %v5426_v36 = vld [vmem:[#allocation4 + $0x5c0] sm:$0xff]  }
 0x831   : > { %v3130_v46 = vadd.f32 %v3129_v44, %v2920_v38  ;;  %v3171_v47 = vadd.f32 %v3170_v45, %v2928_v39  ;;  %v3131_v48 = vpop.f32.mrb[34].mxu0  ;;  %v3172_v49 = vpop.f32.mrb[34].mxu1  ;;  %v4577_v39 = vld [vmem:[%s5780_s4 + $0x4] ss:$0 sm:$0xff] }
 0x832   : > { %v3175_v50 = vmul.f32 0.2, %v3128_v42  ;;  %v3177_v51 = vmul.f32 0.2, %v3169_v43  ;;  %v3132_v52 = vpop.f32.mrb[35].mxu0  ;;  %v3173_v53 = vpop.f32.mrb[35].mxu1 }
 0x833   : > { %v3176_v54 = vmul.f32 0.2, %v3130_v46  ;;  %v3178_v55 = vmul.f32 0.2, %v3171_v47  ;;  %v5428_v52 = vld [vmem:[#allocation4 + $0x580] sm:$0xff]  }
 0x834   : > { %v3179_v56 = vmax.f32 %v3128_v42, %v3175_v50  ;;  %v3181_v57 = vmax.f32 %v3169_v43, %v3177_v51  ;;  %v5427_v51 = vld [vmem:[#allocation4 + $0x500] sm:$0xff]  }
 0x835   : > { %v3180_v58 = vmax.f32 %v3130_v46, %v3176_v54  ;;  %v3182_v59 = vmax.f32 %v3171_v47, %v3178_v55  ;;  %v5429_v54 = vld [vmem:[#allocation4 + $0x548] sm:$0xff]  }
 0x836   : > { %v3183_v2 = vpack.c.bf16 %v3179_v56, %v3179_v56  ;;  %v3185_v3 = vpack.c.bf16 %v3181_v57, %v3181_v57  ;;  %v5430_v55 = vld [vmem:[#allocation4 + $0x5c8] sm:$0xff]  }
 0x837   : > { %v3184_v61 = vpack.c.bf16 %v3180_v58, %v3180_v58  ;;  %v3186_v62 = vpack.c.bf16 %v3182_v59, %v3182_v59  ;;  %v5431_v56 = vld [vmem:[#allocation4 + $0x508] sm:$0xff]   ;;  %v5433_v58 = vld [vmem:[#allocation4 + $0x550] sm:$0xff]  }
 0x838   : > { %v5432_v57 = vld [vmem:[#allocation4 + $0x588] sm:$0xff]   ;;  %v5434_v59 = vld [vmem:[#allocation4 + $0x5d0] sm:$0xff]  }
 0x839   : > { %3484 = vmatprep.mubr.bf16.mxu0 %v3184_v61  ;;  %3524 = vmatprep.mubr.bf16.mxu1 %v3186_v62  ;;  %v5436_v61 = vld [vmem:[#allocation4 + $0x590] sm:$0xff]   ;;  %v5437_v62 = vld [vmem:[#allocation4 + $0x558] sm:$0xff]  }
 0x83a   : > { %3485 = vmatmul.mubr.bf16.vlgmr.msra.gmra.mrb[36].mxu0 %v3183_v2  ;;  %3525 = vmatmul.mubr.bf16.vlgmr.msra.gmra.mrb[36].mxu1 %v3185_v3  ;;  %v5440_v2 = vld [vmem:[#allocation4 + $0x598] sm:$0xff]   ;;  %v5441_v3 = vld [vmem:[#allocation4 + $0x560] sm:$0xff]  }
 0x83b   : > { %3751 = vmatpush1.bf16.msra.mxu0 %v5377_v63  ;;  %3792 = vmatpush1.bf16.msra.mxu1 %v5380_v1  ;;  %v5438_v63 = vld [vmem:[#allocation4 + $0x5d8] sm:$0xff]  }
 0x83c   : > { %3752 = vmatprep.subr.bf16.mxu0 %v5385_v4  ;;  %3793 = vmatprep.subr.bf16.mxu1 %v5388_v5  ;;  %v5439_v1 = vld [vmem:[#allocation4 + $0x518] sm:$0xff]   ;;  %v5442_v4 = vld [vmem:[#allocation4 + $0x5e0] sm:$0xff]  }
 0x83d   : > { %3782 = vmatprep.mubr.bf16.mxu0 %v5536_v0  ;;  %3823 = vmatprep.mubr.bf16.mxu1 %v5536_v0  ;;  %v5404_v0 = vld [vmem:[#allocation2 + $0x588] ss:$16 sps:$4 sm:$0xff]   ;;  %v5443_v5 = vld [vmem:[#allocation4 + $0x520] sm:$0xff]  }
 0x83f   : > { %3753 = vmatpush1.bf16.msra.mxu0 %v5383_v7  ;;  %3794 = vmatpush1.bf16.msra.mxu1 %v5386_v6  ;;  %v5444_v7 = vld [vmem:[#allocation4 + $0x5a0] sm:$0xff]   ;;  %v5445_v6 = vld [vmem:[#allocation4 + $0x568] sm:$0xff]  }
 0x840   : > { %3754 = vmatprep.subr.bf16.mxu0 %v5391_v10  ;;  %3795 = vmatprep.subr.bf16.mxu1 %v5394_v13  ;;  %v5446_v10 = vld [vmem:[#allocation4 + $0x5e8] sm:$0xff]  }
 0x841   : > { %v5447_v13 = vld [vmem:[#allocation4 + $0x528] sm:$0xff]  }
 0x843   : > { %3755 = vmatpush1.bf16.msra.mxu0 %v5389_v14  ;;  %3796 = vmatpush1.bf16.msra.mxu1 %v5392_v15  ;;  %v5448_v14 = vld [vmem:[#allocation4 + $0x5a8] sm:$0xff]   ;;  %v5449_v15 = vld [vmem:[#allocation4 + $0x570] sm:$0xff]  }
 0x844   : > { %3756 = vmatprep.subr.bf16.mxu0 %v5397_v16  ;;  %3797 = vmatprep.subr.bf16.mxu1 %v5400_v17  ;;  %v5450_v16 = vld [vmem:[#allocation4 + $0x5f0] sm:$0xff]  }
 0x845   : > { %v5451_v17 = vld [vmem:[#allocation4 + $0x530] sm:$0xff]  }
 0x847   : > { %3757 = vmatpush1.bf16.msra.mxu0 %v5395_v18  ;;  %3798 = vmatpush1.bf16.msra.mxu1 %v5398_v20  ;;  %v5452_v18 = vld [vmem:[#allocation4 + $0x5b0] sm:$0xff]   ;;  %v5453_v20 = vld [vmem:[#allocation4 + $0x578] sm:$0xff]  }
 0x848   : > { %3758 = vmatprep.subr.bf16.mxu0 %v5403_v19  ;;  %3799 = vmatprep.subr.bf16.mxu1 %v5406_v21  ;;  %v5454_v19 = vld [vmem:[#allocation4 + $0x5f8] sm:$0xff]  }
 0x849   : > { %v5455_v21 = vld [vmem:[#allocation4 + $0x538] sm:$0xff]  }
 0x84b   : > { %3759 = vmatpush1.bf16.msra.mxu0 %v5401_v22  ;;  %3800 = vmatpush1.bf16.msra.mxu1 %v5404_v0  ;;  %v5456_v22 = vld [vmem:[#allocation4 + $0x5b8] sm:$0xff]   ;;  %v4610_v0 = vld [vmem:[%s5778_s2 + $0x14] sm:$0xf] }
 0x84c   : > { %3760 = vmatprep.subr.bf16.mxu0 %v5409_v23  ;;  %3801 = vmatprep.subr.bf16.mxu1 %v5412_v24  ;;  %v3573_v23 = vrot.slane %v4610_v0, %v5664_v8  ;;  %v3581_v24 = vrot.slane %v4610_v0, %v5666_v9 }
 0x84f   : > { %3761 = vmatpush1.bf16.msra.mxu0 %v5407_v25  ;;  %3802 = vmatpush1.bf16.msra.mxu1 %v5410_v26  ;;  %v3577_v25 = vrot.slane %v4610_v0, %v5671_v11  ;;  %v3585_v26 = vrot.slane %v4610_v0, %v5673_v12 }
 0x850   : > { %3762 = vmatprep.subr.bf16.mxu0 %v5415_v27  ;;  %3803 = vmatprep.subr.bf16.mxu1 %v5418_v29 }
 0x853   : > { %3763 = vmatpush1.bf16.msra.mxu0 %v5413_v28  ;;  %3804 = vmatpush1.bf16.msra.mxu1 %v5416_v30 }
 0x854   : > { %3764 = vmatprep.subr.bf16.mxu0 %v5421_v31  ;;  %3805 = vmatprep.subr.bf16.mxu1 %v5424_v32 }
 0x857   : > { %3765 = vmatpush1.bf16.msra.mxu0 %v5419_v33  ;;  %3806 = vmatpush1.bf16.msra.mxu1 %v5422_v34 }
 0x858   : > { %4899 = vmatprep.subr.bf16.mxu0 %v5425_v35  ;;  %4921 = vmatprep.subr.bf16.mxu1 %v5426_v36 }
 0x90d   : > { %v4871_v37 = vpop.f32.mrb[36].mxu0  ;;  %v4893_v38 = vpop.f32.mrb[36].mxu1 }
 0x90e   : > { %v4872_v40 = vpop.f32.mrb[37].mxu0  ;;  %v4894_v41 = vpop.f32.mrb[37].mxu1 }
 0x90f   : > { %v4873_v42 = vadd.f32 %v4872_v40, %v4871_v37  ;;  %v4895_v43 = vadd.f32 %v4894_v41, %v4893_v38  ;;  %v4874_v44 = vpop.f32.mrb[38].mxu0  ;;  %v4896_v45 = vpop.f32.mrb[38].mxu1 }
 0x910   : > { %v4875_v46 = vpop.f32.mrb[39].mxu0  ;;  %v4897_v47 = vpop.f32.mrb[39].mxu1 }
 0x911   : > { %v3487_v48 = vadd.f32 %v4873_v42, %v4577_v39 }
 0x913   : > { %v3527_v49 = vadd.f32 %v4895_v43, %v3487_v48 }
 0x915   : > { %v5753_v50 = vadd.f32 %v3527_v49, %v5736_v60  ;;  %v5435_v60 = vld [vmem:[#allocation4 + $0x510] sm:$0xff]   ;;  %v4644_v49 = vld [vmem:[%s5780_s4 + $0x5] ss:$0 sm:$0xff] }
 0x917   : > { %v3533_v53 = vpack.c.bf16 %v5753_v50, %v5753_v50 }
 0x919   : > { %3783 = vmatmul.mubr.bf16.vlgmr.msra.gmra.mrb[40].mxu0 %v3533_v53  ;;  %3824 = vmatmul.mubr.bf16.vlgmr.msra.gmra.mrb[40].mxu1 %v3533_v53 }
 0x91a   : > { %4900 = vmatpush3.bf16.msra.mxu0 %v5427_v51  ;;  %4922 = vmatpush3.bf16.msra.mxu1 %v5428_v52 }
 0x91b   : > { %4901 = vmatprep.subr.bf16.mxu0 %v5429_v54  ;;  %4923 = vmatprep.subr.bf16.mxu1 %v5430_v55 }
 0x91e   : > { %4902 = vmatpush3.bf16.msra.mxu0 %v5431_v56  ;;  %4924 = vmatpush3.bf16.msra.mxu1 %v5432_v57 }
 0x91f   : > { %4903 = vmatprep.subr.bf16.mxu0 %v5433_v58  ;;  %4925 = vmatprep.subr.bf16.mxu1 %v5434_v59 }
 0x922   : > { %4904 = vmatpush3.bf16.msra.mxu0 %v5435_v60  ;;  %4926 = vmatpush3.bf16.msra.mxu1 %v5436_v61 }
 0x923   : > { %4905 = vmatprep.subr.bf16.mxu0 %v5437_v62  ;;  %4927 = vmatprep.subr.bf16.mxu1 %v5438_v63 }
 0x926   : > { %4906 = vmatpush3.bf16.msra.mxu0 %v5439_v1  ;;  %4928 = vmatpush3.bf16.msra.mxu1 %v5440_v2 }
 0x927   : > { %4907 = vmatprep.subr.bf16.mxu0 %v5441_v3  ;;  %4929 = vmatprep.subr.bf16.mxu1 %v5442_v4 }
 0x92a   : > { %4908 = vmatpush3.bf16.msra.mxu0 %v5443_v5  ;;  %4930 = vmatpush3.bf16.msra.mxu1 %v5444_v7 }
 0x92b   : > { %4909 = vmatprep.subr.bf16.mxu0 %v5445_v6  ;;  %4931 = vmatprep.subr.bf16.mxu1 %v5446_v10 }
 0x92e   : > { %4910 = vmatpush3.bf16.msra.mxu0 %v5447_v13  ;;  %4932 = vmatpush3.bf16.msra.mxu1 %v5448_v14 }
 0x92f   : > { %4911 = vmatprep.subr.bf16.mxu0 %v5449_v15  ;;  %4933 = vmatprep.subr.bf16.mxu1 %v5450_v16 }
 0x932   : > { %4912 = vmatpush3.bf16.msra.mxu0 %v5451_v17  ;;  %4934 = vmatpush3.bf16.msra.mxu1 %v5452_v18 }
 0x933   : > { %4913 = vmatprep.subr.bf16.mxu0 %v5453_v20  ;;  %4935 = vmatprep.subr.bf16.mxu1 %v5454_v19 }
 0x936   : > { %4914 = vmatpush3.bf16.msra.mxu0 %v5455_v21  ;;  %4936 = vmatpush3.bf16.msra.mxu1 %v5456_v22 }
 0x9ec   : > { %v3784_v27 = vpop.f32.mrb[40].mxu0  ;;  %v3825_v29 = vpop.f32.mrb[40].mxu1 }
 0x9ed   : > { %v3785_v28 = vadd.f32 %v3784_v27, %v3573_v23  ;;  %v3826_v30 = vadd.f32 %v3825_v29, %v3581_v24  ;;  %v3786_v31 = vpop.f32.mrb[41].mxu0  ;;  %v3827_v32 = vpop.f32.mrb[41].mxu1 }
 0x9ee   : > { %v3787_v33 = vadd.f32 %v3786_v31, %v3577_v25  ;;  %v3828_v34 = vadd.f32 %v3827_v32, %v3585_v26  ;;  %v3788_v35 = vpop.f32.mrb[42].mxu0  ;;  %v3829_v36 = vpop.f32.mrb[42].mxu1 }
 0x9ef   : > { %v3832_v37 = vmul.f32 0.2, %v3785_v28  ;;  %v3834_v38 = vmul.f32 0.2, %v3826_v30  ;;  %v3789_v39 = vpop.f32.mrb[43].mxu0  ;;  %v3830_v8 = vpop.f32.mrb[43].mxu1 }
 0x9f0   : > { %v3833_v40 = vmul.f32 0.2, %v3787_v33  ;;  %v3835_v9 = vmul.f32 0.2, %v3828_v34 }
 0x9f1   : > { %v3836_v41 = vmax.f32 %v3785_v28, %v3832_v37  ;;  %v3838_v11 = vmax.f32 %v3826_v30, %v3834_v38 }
 0x9f2   : > { %v3837_v42 = vmax.f32 %v3787_v33, %v3833_v40  ;;  %v3839_v12 = vmax.f32 %v3828_v34, %v3835_v9 }
 0x9f3   : > { %v3840_v45 = vpack.c.bf16 %v3836_v41, %v3836_v41  ;;  %v3842_v46 = vpack.c.bf16 %v3838_v11, %v3838_v11 }
 0x9f4   : > { %v3841_v43 = vpack.c.bf16 %v3837_v42, %v3837_v42  ;;  %v3843_v44 = vpack.c.bf16 %v3839_v12, %v3839_v12 }
 0x9f6   : > { %4141 = vmatprep.mubr.bf16.mxu0 %v3841_v43  ;;  %4181 = vmatprep.mubr.bf16.mxu1 %v3843_v44 }
 0x9f7   : > { %4142 = vmatmul.mubr.bf16.vlgmr.msra.gmra.mrb[44].mxu0 %v3840_v45  ;;  %4182 = vmatmul.mubr.bf16.vlgmr.msra.gmra.mrb[44].mxu1 %v3842_v46 }
 0xaca   : > { %v4915_v47 = vpop.f32.mrb[44].mxu0  ;;  %v4937_v48 = vpop.f32.mrb[44].mxu1 }
 0xacb   : > { %v4916_v51 = vpop.f32.mrb[45].mxu0  ;;  %v4938_v52 = vpop.f32.mrb[45].mxu1 }
 0xacc   : > { %v4917_v53 = vadd.f32 %v4916_v51, %v4915_v47  ;;  %v4939_v54 = vadd.f32 %v4938_v52, %v4937_v48  ;;  %v4918_v55 = vpop.f32.mrb[46].mxu0  ;;  %v4940_v56 = vpop.f32.mrb[46].mxu1 }
 0xacd   : > { %v4919_v57 = vpop.f32.mrb[47].mxu0  ;;  %v4941_v58 = vpop.f32.mrb[47].mxu1 }
 0xace   : > { %v4144_v59 = vadd.f32 %v4917_v53, %v4644_v49 }
 0xad0   : > { %v4184_v60 = vadd.f32 %v4939_v54, %v4144_v59 }
 0xad2   : > { %v4189_v61 = vadd.f32 %v4184_v60, %v5753_v50 }
 0xad4   : > { %4190 = vst [vmem:[%s249_s10] sm:$0xff] %v4189_v61 }
 0xad5 PF: > { %s17_s18 = sadd.s32 1, %s5528_s18  }
 0xad6   : > { %p14_p9 = scmp.ge.s32.totalorder %s17_s18, 6  }
 0xad8   :  { %16 = sbr.rel (!%p14_p9) target bundleno = 2 (0x2), region = 99 }
 0xadf   :  { %4210 = vsyncpa [#allocation3], 1 }
 0xae0   :  { %4212 = vsyncpa [#allocation3 + $0x1], 1 }
 0xae1   :  { %4213 = vsyncpa [#allocation5], 1 }

</bundles_post_ra>
